<compile_context>
chip_gen: v5e
topology: v5e:2x2
jax: 0.10.0
libtpu: 0.0.40
codegen_flags: <defaults>
</compile_context>

<pallas_src>
import functools

import jax
import jax.numpy as jnp
from jax import lax
from jax.experimental import pallas as pl
from jax.experimental.pallas import tpu as pltpu


def _round_up(x, m):
    return (x + m - 1) // m * m


def _pick_chunk(seq_len, max_chunk):
    if seq_len <= max_chunk:
        return seq_len
    # Prefer a chunk that divides S (no masked/padded timesteps); otherwise
    # take max_chunk and mask the tail of the last chunk.
    for c in range(max_chunk, max_chunk // 2, -1):
        if seq_len % c == 0:
            return c
    return max_chunk


# ----------------------------------------------------------------------------
# Pallas kernel: GRU recurrence over one chunk of timesteps.
# PyTorch gate order / math (with b_hh[r], b_hh[z] pre-folded into gx):
#   r = sigmoid(gx_r + Whr h)
#   z = sigmoid(gx_z + Whz h)
#   n = tanh  (gx_n + r * (Whn h + bhn))
#   h' = n + z * (h - n)
# ----------------------------------------------------------------------------
def _gru_rec_kernel(gx_ref, whh_ref, bhn_ref, y_ref, hn_ref, h_scratch,
                    *, chunk, seq_len, hidden_pad):
    c = pl.program_id(0)

    @pl.when(c == 0)
    def _init():
        # PyTorch default: h0 = zeros.
        h_scratch[...] = jnp.zeros_like(h_scratch)

    hp = hidden_pad
    bp = h_scratch.shape[0]

    whh = whh_ref[...]                         # (Hp, 3Hp), MXU dtype (bf16/f32)
    # Hoisted bias broadcast (JAX does not CSE broadcast_in_dim).
    bhn = jnp.broadcast_to(bhn_ref[...].astype(jnp.float32), (bp, hp))

    needs_mask = (seq_len % chunk) != 0        # static

    # Statically unrolled inner loop over the chunk (recurrence is sequential).
    for i in range(chunk):
        h_prev = h_scratch[...]                               # (Bp, Hp) f32
        gx = gx_ref[i].astype(jnp.float32)                    # (Bp, 3Hp) f32

        gh = jnp.dot(h_prev.astype(whh.dtype), whh,
                     preferred_element_type=jnp.float32)      # (Bp, 3Hp) f32

        # Gate slabs are Hp(=128k)-aligned -> lane-aligned slices, no shuffles.
        r = jax.nn.sigmoid(gx[:, 0:hp] + gh[:, 0:hp])
        z = jax.nn.sigmoid(gx[:, hp:2 * hp] + gh[:, hp:2 * hp])
        n = jnp.tanh(gx[:, 2 * hp:3 * hp] + r * (gh[:, 2 * hp:3 * hp] + bhn))
        h_new = n + z * (h_prev - n)                          # (Bp, Hp) f32

        if needs_mask:
            valid = (c * chunk + i) < seq_len
            h_new = jnp.where(valid, h_new, h_prev)

        h_scratch[...] = h_new
        y_ref[i] = h_new.astype(y_ref.dtype)                  # lane-dense store

    @pl.when(c == pl.num_programs(0) - 1)
    def _store_hn():
        # Only the final grid step writes h_n (masking keeps h fixed past S-1).
        hn_ref[...] = h_scratch[...].astype(hn_ref.dtype)


def _gru_recurrence_pallas(gx_pad, whh_t_pad, bhn_pad, *, seq_len, chunk,
                           hidden_pad, mxu_dtype, out_dtype=jnp.float32):
    """gx_pad: (S_pad, Bp, 3Hp) f32 pre-activations (input projection + folded
    biases already applied). whh_t_pad: (Hp, 3Hp); bhn_pad: (1, Hp).
    Returns y (S_pad, Bp, Hp) and h_n (Bp, Hp)."""
    s_pad, bp, g = gx_pad.shape
    hp = hidden_pad
    grid = s_pad // chunk

    whh_mxu = whh_t_pad.astype(mxu_dtype)

    # Rough VMEM estimate (double buffers) with headroom, capped for v7x (64MiB).
    f32b = 4
    wb = jnp.dtype(mxu_dtype).itemsize
    ob = jnp.dtype(out_dtype).itemsize
    est = (2 * chunk * bp * g * f32b        # gx blocks
           + 2 * chunk * bp * hp * ob       # y blocks
           + 2 * hp * g * wb                # W_hh^T
           + 2 * hp * f32b                  # b_hh(n)
           + 3 * bp * hp * f32b)            # h_n + scratch
    vmem_limit = int(min(max(2 * est + (8 << 20), 16 << 20), 56 << 20))

    kernel = functools.partial(_gru_rec_kernel, chunk=chunk, seq_len=seq_len,
                               hidden_pad=hp)

    y, h_n = pl.pallas_call(
        kernel,
        out_shape=(
            jax.ShapeDtypeStruct((s_pad, bp, hp), out_dtype),
            jax.ShapeDtypeStruct((bp, hp), out_dtype),
        ),
        grid_spec=pltpu.PrefetchScalarGridSpec(
            num_scalar_prefetch=0,
            grid=(grid,),
            in_specs=[
                pl.BlockSpec((chunk, bp, g), lambda c: (c, 0, 0)),  # gx chunk
                pl.BlockSpec((hp, g), lambda c: (0, 0)),            # W_hh^T (resident)
                pl.BlockSpec((1, hp), lambda c: (0, 0)),            # b_hh(n) (resident)
            ],
            out_specs=[
                pl.BlockSpec((chunk, bp, hp), lambda c: (c, 0, 0)),  # y chunk
                pl.BlockSpec((bp, hp), lambda c: (0, 0)),            # h_n (resident)
            ],
            scratch_shapes=[pltpu.VMEM((bp, hp), jnp.float32)],
        ),
        compiler_params=pltpu.CompilerParams(
            dimension_semantics=("arbitrary",),   # recurrence: sequential grid
            vmem_limit_bytes=vmem_limit,
        ),
    )(gx_pad, whh_mxu, bhn_pad)
    return y, h_n


# ----------------------------------------------------------------------------
# Weight preparation: transpose + gate-aligned padding (r|z|n each Hp wide).
# Padding columns/rows are zero, which keeps padded hidden lanes exactly zero.
# ----------------------------------------------------------------------------
def _prep_wih(w_ih, b_ih, H, Hp, d_in_actual):
    d_in_w = w_ih.shape[1]
    w = w_ih.reshape(3, H, d_in_w)
    w = jnp.pad(w, ((0, 0), (0, Hp - H), (0, d_in_actual - d_in_w)))
    w_t = jnp.transpose(w, (2, 0, 1)).reshape(d_in_actual, 3 * Hp)   # (D, 3Hp)
    b = jnp.pad(b_ih.reshape(3, H), ((0, 0), (0, Hp - H))).reshape(3 * Hp)
    return w_t.astype(jnp.float32), b.astype(jnp.float32)


def _prep_whh(w_hh, b_hh, H, Hp):
    w = w_hh.reshape(3, H, H)
    w = jnp.pad(w, ((0, 0), (0, Hp - H), (0, Hp - H)))
    w_t = jnp.transpose(w, (2, 0, 1)).reshape(Hp, 3 * Hp)            # (Hp, 3Hp)
    b = jnp.pad(b_hh.reshape(3, H), ((0, 0), (0, Hp - H))).reshape(3 * Hp)
    return w_t.astype(jnp.float32), b.astype(jnp.float32)


# ----------------------------------------------------------------------------
# S_RNN forward: permute -> per-layer (hoisted projection + Pallas recurrence)
# -> permute back. Matches the PyTorch module's forward.
# ----------------------------------------------------------------------------
def s_rnn_forward(x_bse, params, *, mxu_dtype=jnp.bfloat16, max_chunk=32):
    """x_bse: (B, S, embed_dim). params: list of (w_ih, w_hh, b_ih, b_hh)."""
    B, S, _ = x_bse.shape
    H = params[0][1].shape[1]
    Hp = _round_up(H, 128)            # lane-aligned hidden
    Bp = _round_up(B, 8)              # sublane-aligned batch
    chunk = _pick_chunk(S, max_chunk)
    S_pad = _round_up(S, chunk)

    # (B,S,E) -> time-major (S_pad, Bp, E), zero-padded.
    inp = jnp.transpose(x_bse, (1, 0, 2)).astype(jnp.float32)
    inp = jnp.pad(inp, ((0, S_pad - S), (0, Bp - B), (0, 0)))

    h_list = []
    for (w_ih, w_hh, b_ih, b_hh) in params:
        d_in = inp.shape[-1]
        wih_t, bih = _prep_wih(w_ih, b_ih, H, Hp, d_in)
        whh_t, bhh = _prep_whh(w_hh, b_hh, H, Hp)

        # Fold the r/z hidden biases into the hoisted projection bias; only the
        # n-gate hidden bias must stay inside r * (...) in the kernel.
        bias_proj = bih + jnp.concatenate(
            [bhh[:2 * Hp], jnp.zeros((Hp,), jnp.float32)])
        bhn = bhh[2 * Hp:].reshape(1, Hp)

        # Hoisted input projection: one big batched matmul (no seq dependency).
        if mxu_dtype == jnp.float32:
            x_mm, w_mm = inp, wih_t
        else:
            x_mm, w_mm = inp.astype(mxu_dtype), wih_t.astype(mxu_dtype)
        gx = jnp.einsum("sbd,dg->sbg", x_mm, w_mm,
                        preferred_element_type=jnp.float32) \
             + bias_proj[None, None, :]

        # Pallas recurrent kernel.
        inp, h_n = _gru_recurrence_pallas(
            gx, whh_t, bhn, seq_len=S, chunk=chunk, hidden_pad=Hp,
            mxu_dtype=mxu_dtype)
        h_list.append(h_n)

    out = jnp.transpose(inp[:S, :B, :H], (1, 0, 2))                 # (B, S, H)
    hidden = jnp.stack([h[:B, :H] for h in h_list], axis=0)         # (L, B, H)
    hidden = jnp.transpose(hidden, (1, 0, 2))                       # (B, L, H)
    return out, hidden


# ----------------------------------------------------------------------------
# Pure-JAX reference GRU (correctness check), identical math in f32.
# ----------------------------------------------------------------------------
def gru_layer_ref(x_tbd, w_ih, w_hh, b_ih, b_hh):
    _, B, _ = x_tbd.shape
    H = w_hh.shape[1]

    def step(h, x_t):
        gx = x_t @ w_ih.T + b_ih
        gh = h @ w_hh.T + b_hh
        r = jax.nn.sigmoid(gx[:, 0:H] + gh[:, 0:H])
        z = jax.nn.sigmoid(gx[:, H:2 * H] + gh[:, H:2 * H])
        n = jnp.tanh(gx[:, 2 * H:3 * H] + r * gh[:, 2 * H:3 * H])
        h_new = (1.0 - z) * n + z * h
        return h_new, h_new

    h0 = jnp.zeros((B, H), jnp.float32)
    h_last, ys = lax.scan(step, h0, x_tbd.astype(jnp.float32))
    return ys, h_last


def s_rnn_ref(x_bse, params):
    inp = jnp.transpose(x_bse, (1, 0, 2))
    h_list = []
    for (w_ih, w_hh, b_ih, b_hh) in params:
        inp, h_n = gru_layer_ref(inp, w_ih, w_hh, b_ih, b_hh)
        h_list.append(h_n)
    out = jnp.transpose(inp, (1, 0, 2))
    hidden = jnp.transpose(jnp.stack(h_list, axis=0), (1, 0, 2))
    return out, hidden


# ----------------------------------------------------------------------------
# Deterministic parameter init (PyTorch-style uniform(-1/sqrt(H), 1/sqrt(H))).
# ----------------------------------------------------------------------------
def init_gru_params(key, embed_dim, hidden_dim, n_layers):
    bound = 1.0 / jnp.sqrt(hidden_dim)
    params = []
    for layer in range(n_layers):
        d_in = embed_dim if layer == 0 else hidden_dim
        key, k1, k2, k3, k4 = jax.random.split(key, 5)
        w_ih = jax.random.uniform(k1, (3 * hidden_dim, d_in),
                                  jnp.float32, -bound, bound)
        w_hh = jax.random.uniform(k2, (3 * hidden_dim, hidden_dim),
                                  jnp.float32, -bound, bound)
        b_ih = jax.random.uniform(k3, (3 * hidden_dim,),
                                  jnp.float32, -bound, bound)
        b_hh = jax.random.uniform(k4, (3 * hidden_dim,),
                                  jnp.float32, -bound, bound)
        params.append((w_ih, w_hh, b_ih, b_hh))
    return params


if __name__ == "__main__":
    batch, seq, embed_dim, hidden_dim, n_layers = 2, 8, 16, 32, 2

    key = jax.random.PRNGKey(0)
    key, kx = jax.random.split(key)
    x = jax.random.normal(kx, (batch, seq, embed_dim), jnp.float32)
    params = init_gru_params(key, embed_dim, hidden_dim, n_layers)

    out_ref, hidden_ref = jax.block_until_ready(s_rnn_ref(x, params))

    # 1) f32 MXU path: strict numerical check against the reference.
    out32, hid32 = jax.block_until_ready(
        s_rnn_forward(x, params, mxu_dtype=jnp.float32))
    assert out32.shape == (batch, seq, hidden_dim)
    assert hid32.shape == (batch, n_layers, hidden_dim)
    assert jnp.allclose(out32, out_ref, atol=1e-5, rtol=1e-5)
    assert jnp.allclose(hid32, hidden_ref, atol=1e-5, rtol=1e-5)

    # 2) Default bf16-MXU path (perf configuration on v6e/v7x): loose check.
    out_bf, hid_bf = jax.block_until_ready(s_rnn_forward(x, params))
    assert out_bf.shape == (batch, seq, hidden_dim)
    assert hid_bf.shape == (batch, n_layers, hidden_dim)
    assert jnp.allclose(out_bf, out_ref, atol=5e-2, rtol=5e-2)
    assert jnp.allclose(hid_bf, hidden_ref, atol=5e-2, rtol=5e-2)

    print("KERNEL_OK")
</pallas_src>

<mosaic_0001>
module attributes {stable_mosaic.version = 11 : i64} {
  func.func @_gru_rec_kernel(%arg0: i32, %arg1: memref<8x8x384xf32, #tpu.memory_space<vmem>>, %arg2: memref<128x384xf32, #tpu.memory_space<vmem>>, %arg3: memref<1x128xf32, #tpu.memory_space<vmem>>, %arg4: memref<8x8x128xf32, #tpu.memory_space<vmem>>, %arg5: memref<8x128xf32, #tpu.memory_space<vmem>>, %arg6: memref<8x128xf32, #tpu.memory_space<vmem>>) attributes {dimension_semantics = [#tpu.dimension_semantics<arbitrary>], iteration_bounds = array<i64: 1>, scalar_prefetch = 0 : i64, scratch_operands = 1 : i64, tpu.core_type = #tpu.core_type<tc>, window_params = [{transform_indices = @transform_0, window_bounds = array<i64: 8, 8, 384>}, {pipeline_mode = #tpu.pipeline_mode<synchronous>, transform_indices = @transform_1, window_bounds = array<i64: 128, 384>}, {pipeline_mode = #tpu.pipeline_mode<synchronous>, transform_indices = @transform_2, window_bounds = array<i64: 1, 128>}, {transform_indices = @transform_3, window_bounds = array<i64: 8, 8, 128>}, {pipeline_mode = #tpu.pipeline_mode<synchronous>, transform_indices = @transform_4, window_bounds = array<i64: 8, 128>}]} {
    %c0_i32 = arith.constant 0 : i32
    %0 = arith.cmpi eq, %arg0, %c0_i32 : i32
    %1 = arith.extui %0 : i1 to i32
    %c0_i32_0 = arith.constant 0 : i32
    %2 = arith.cmpi ne, %1, %c0_i32_0 : i32
    scf.if %2 {
      %cst_102 = arith.constant 0.000000e+00 : f32
      %274 = vector.broadcast %cst_102 : f32 to vector<8x128xf32>
      %c0_103 = arith.constant 0 : index
      %c0_104 = arith.constant 0 : index
      %275 = vector.load %arg6[%c0_103, %c0_104] : memref<8x128xf32, #tpu.memory_space<vmem>>, vector<8x128xf32>
      tpu.vector_store %arg6[%c0_103, %c0_104], %274 {strides = array<i32>} : memref<8x128xf32, #tpu.memory_space<vmem>>, vector<8x128xf32>,
    } else {
    }
    %c0 = arith.constant 0 : index
    %c0_1 = arith.constant 0 : index
    %3 = vector.load %arg2[%c0, %c0_1] : memref<128x384xf32, #tpu.memory_space<vmem>>, vector<128x384xf32>
    %c0_2 = arith.constant 0 : index
    %c0_3 = arith.constant 0 : index
    %4 = vector.load %arg3[%c0_2, %c0_3] : memref<1x128xf32, #tpu.memory_space<vmem>>, vector<1x128xf32>
    %5 = vector.shape_cast %4 : vector<1x128xf32> to vector<1x128xf32>
    %6 = vector.broadcast %5 : vector<1x128xf32> to vector<8x128xf32>
    %c0_4 = arith.constant 0 : index
    %c0_5 = arith.constant 0 : index
    %7 = vector.load %arg6[%c0_4, %c0_5] : memref<8x128xf32, #tpu.memory_space<vmem>>, vector<8x128xf32>
    %c0_6 = arith.constant 0 : index
    %c0_7 = arith.constant 0 : index
    %c0_8 = arith.constant 0 : index
    %8 = vector.load %arg1[%c0_6, %c0_7, %c0_8] : memref<8x8x384xf32, #tpu.memory_space<vmem>>, vector<1x8x384xf32>
    %9 = vector.shape_cast %8 : vector<1x8x384xf32> to vector<8x384xf32>
    %cst = arith.constant dense<0.000000e+00> : vector<8x384xf32>
    %10 = tpu.matmul %7, %3, %cst {dimension_numbers = #tpu.dot_dimension_numbers<[1], [0], [0], [1], [0, 0, 1, 1], [], []>} : vector<8x128xf32>, vector<128x384xf32>, vector<8x384xf32> -> vector<8x384xf32>
    %11 = vector.extract_strided_slice %9 {offsets = [0, 0], sizes = [8, 128], strides = [1, 1]} : vector<8x384xf32> to vector<8x128xf32>
    %12 = vector.extract_strided_slice %10 {offsets = [0, 0], sizes = [8, 128], strides = [1, 1]} : vector<8x384xf32> to vector<8x128xf32>
    %13 = arith.addf %11, %12 : vector<8x128xf32>
    %14 = arith.negf %13 : vector<8x128xf32>
    %15 = math.exp %14 : vector<8x128xf32>
    %cst_9 = arith.constant 1.000000e+00 : f32
    %16 = vector.broadcast %cst_9 : f32 to vector<8x128xf32>
    %17 = arith.addf %16, %15 : vector<8x128xf32>
    %18 = arith.divf %16, %17 : vector<8x128xf32>
    %19 = vector.extract_strided_slice %9 {offsets = [0, 128], sizes = [8, 128], strides = [1, 1]} : vector<8x384xf32> to vector<8x128xf32>
    %20 = vector.extract_strided_slice %10 {offsets = [0, 128], sizes = [8, 128], strides = [1, 1]} : vector<8x384xf32> to vector<8x128xf32>
    %21 = arith.addf %19, %20 : vector<8x128xf32>
    %22 = arith.negf %21 : vector<8x128xf32>
    %23 = math.exp %22 : vector<8x128xf32>
    %cst_10 = arith.constant 1.000000e+00 : f32
    %24 = vector.broadcast %cst_10 : f32 to vector<8x128xf32>
    %25 = arith.addf %24, %23 : vector<8x128xf32>
    %26 = arith.divf %24, %25 : vector<8x128xf32>
    %27 = vector.extract_strided_slice %9 {offsets = [0, 256], sizes = [8, 128], strides = [1, 1]} : vector<8x384xf32> to vector<8x128xf32>
    %28 = vector.extract_strided_slice %10 {offsets = [0, 256], sizes = [8, 128], strides = [1, 1]} : vector<8x384xf32> to vector<8x128xf32>
    %29 = arith.addf %28, %6 : vector<8x128xf32>
    %30 = arith.mulf %18, %29 : vector<8x128xf32>
    %31 = arith.addf %27, %30 : vector<8x128xf32>
    %32 = math.tanh %31 : vector<8x128xf32>
    %33 = arith.subf %7, %32 : vector<8x128xf32>
    %34 = arith.mulf %26, %33 : vector<8x128xf32>
    %35 = arith.addf %32, %34 : vector<8x128xf32>
    %c0_11 = arith.constant 0 : index
    %c0_12 = arith.constant 0 : index
    %36 = vector.load %arg6[%c0_11, %c0_12] : memref<8x128xf32, #tpu.memory_space<vmem>>, vector<8x128xf32>
    tpu.vector_store %arg6[%c0_11, %c0_12], %35 {strides = array<i32>} : memref<8x128xf32, #tpu.memory_space<vmem>>, vector<8x128xf32>,
    %c0_13 = arith.constant 0 : index
    %c0_14 = arith.constant 0 : index
    %c0_15 = arith.constant 0 : index
    %37 = vector.load %arg4[%c0_13, %c0_14, %c0_15] : memref<8x8x128xf32, #tpu.memory_space<vmem>>, vector<1x8x128xf32>
    %38 = vector.shape_cast %37 : vector<1x8x128xf32> to vector<8x128xf32>
    %39 = vector.shape_cast %35 : vector<8x128xf32> to vector<1x8x128xf32>
    tpu.vector_store %arg4[%c0_13, %c0_14, %c0_15], %39 {strides = array<i32>} : memref<8x8x128xf32, #tpu.memory_space<vmem>>, vector<1x8x128xf32>,
    %c0_16 = arith.constant 0 : index
    %c0_17 = arith.constant 0 : index
    %40 = vector.load %arg6[%c0_16, %c0_17] : memref<8x128xf32, #tpu.memory_space<vmem>>, vector<8x128xf32>
    %c1 = arith.constant 1 : index
    %c0_18 = arith.constant 0 : index
    %c0_19 = arith.constant 0 : index
    %41 = vector.load %arg1[%c1, %c0_18, %c0_19] : memref<8x8x384xf32, #tpu.memory_space<vmem>>, vector<1x8x384xf32>
    %42 = vector.shape_cast %41 : vector<1x8x384xf32> to vector<8x384xf32>
    %cst_20 = arith.constant dense<0.000000e+00> : vector<8x384xf32>
    %43 = tpu.matmul %40, %3, %cst_20 {dimension_numbers = #tpu.dot_dimension_numbers<[1], [0], [0], [1], [0, 0, 1, 1], [], []>} : vector<8x128xf32>, vector<128x384xf32>, vector<8x384xf32> -> vector<8x384xf32>
    %44 = vector.extract_strided_slice %42 {offsets = [0, 0], sizes = [8, 128], strides = [1, 1]} : vector<8x384xf32> to vector<8x128xf32>
    %45 = vector.extract_strided_slice %43 {offsets = [0, 0], sizes = [8, 128], strides = [1, 1]} : vector<8x384xf32> to vector<8x128xf32>
    %46 = arith.addf %44, %45 : vector<8x128xf32>
    %47 = arith.negf %46 : vector<8x128xf32>
    %48 = math.exp %47 : vector<8x128xf32>
    %cst_21 = arith.constant 1.000000e+00 : f32
    %49 = vector.broadcast %cst_21 : f32 to vector<8x128xf32>
    %50 = arith.addf %49, %48 : vector<8x128xf32>
    %51 = arith.divf %49, %50 : vector<8x128xf32>
    %52 = vector.extract_strided_slice %42 {offsets = [0, 128], sizes = [8, 128], strides = [1, 1]} : vector<8x384xf32> to vector<8x128xf32>
    %53 = vector.extract_strided_slice %43 {offsets = [0, 128], sizes = [8, 128], strides = [1, 1]} : vector<8x384xf32> to vector<8x128xf32>
    %54 = arith.addf %52, %53 : vector<8x128xf32>
    %55 = arith.negf %54 : vector<8x128xf32>
    %56 = math.exp %55 : vector<8x128xf32>
    %cst_22 = arith.constant 1.000000e+00 : f32
    %57 = vector.broadcast %cst_22 : f32 to vector<8x128xf32>
    %58 = arith.addf %57, %56 : vector<8x128xf32>
    %59 = arith.divf %57, %58 : vector<8x128xf32>
    %60 = vector.extract_strided_slice %42 {offsets = [0, 256], sizes = [8, 128], strides = [1, 1]} : vector<8x384xf32> to vector<8x128xf32>
    %61 = vector.extract_strided_slice %43 {offsets = [0, 256], sizes = [8, 128], strides = [1, 1]} : vector<8x384xf32> to vector<8x128xf32>
    %62 = arith.addf %61, %6 : vector<8x128xf32>
    %63 = arith.mulf %51, %62 : vector<8x128xf32>
    %64 = arith.addf %60, %63 : vector<8x128xf32>
    %65 = math.tanh %64 : vector<8x128xf32>
    %66 = arith.subf %40, %65 : vector<8x128xf32>
    %67 = arith.mulf %59, %66 : vector<8x128xf32>
    %68 = arith.addf %65, %67 : vector<8x128xf32>
    %c0_23 = arith.constant 0 : index
    %c0_24 = arith.constant 0 : index
    %69 = vector.load %arg6[%c0_23, %c0_24] : memref<8x128xf32, #tpu.memory_space<vmem>>, vector<8x128xf32>
    tpu.vector_store %arg6[%c0_23, %c0_24], %68 {strides = array<i32>} : memref<8x128xf32, #tpu.memory_space<vmem>>, vector<8x128xf32>,
    %c1_25 = arith.constant 1 : index
    %c0_26 = arith.constant 0 : index
    %c0_27 = arith.constant 0 : index
    %70 = vector.load %arg4[%c1_25, %c0_26, %c0_27] : memref<8x8x128xf32, #tpu.memory_space<vmem>>, vector<1x8x128xf32>
    %71 = vector.shape_cast %70 : vector<1x8x128xf32> to vector<8x128xf32>
    %72 = vector.shape_cast %68 : vector<8x128xf32> to vector<1x8x128xf32>
    tpu.vector_store %arg4[%c1_25, %c0_26, %c0_27], %72 {strides = array<i32>} : memref<8x8x128xf32, #tpu.memory_space<vmem>>, vector<1x8x128xf32>,
    %c0_28 = arith.constant 0 : index
    %c0_29 = arith.constant 0 : index
    %73 = vector.load %arg6[%c0_28, %c0_29] : memref<8x128xf32, #tpu.memory_space<vmem>>, vector<8x128xf32>
    %c2 = arith.constant 2 : index
    %c0_30 = arith.constant 0 : index
    %c0_31 = arith.constant 0 : index
    %74 = vector.load %arg1[%c2, %c0_30, %c0_31] : memref<8x8x384xf32, #tpu.memory_space<vmem>>, vector<1x8x384xf32>
    %75 = vector.shape_cast %74 : vector<1x8x384xf32> to vector<8x384xf32>
    %cst_32 = arith.constant dense<0.000000e+00> : vector<8x384xf32>
    %76 = tpu.matmul %73, %3, %cst_32 {dimension_numbers = #tpu.dot_dimension_numbers<[1], [0], [0], [1], [0, 0, 1, 1], [], []>} : vector<8x128xf32>, vector<128x384xf32>, vector<8x384xf32> -> vector<8x384xf32>
    %77 = vector.extract_strided_slice %75 {offsets = [0, 0], sizes = [8, 128], strides = [1, 1]} : vector<8x384xf32> to vector<8x128xf32>
    %78 = vector.extract_strided_slice %76 {offsets = [0, 0], sizes = [8, 128], strides = [1, 1]} : vector<8x384xf32> to vector<8x128xf32>
    %79 = arith.addf %77, %78 : vector<8x128xf32>
    %80 = arith.negf %79 : vector<8x128xf32>
    %81 = math.exp %80 : vector<8x128xf32>
    %cst_33 = arith.constant 1.000000e+00 : f32
    %82 = vector.broadcast %cst_33 : f32 to vector<8x128xf32>
    %83 = arith.addf %82, %81 : vector<8x128xf32>
    %84 = arith.divf %82, %83 : vector<8x128xf32>
    %85 = vector.extract_strided_slice %75 {offsets = [0, 128], sizes = [8, 128], strides = [1, 1]} : vector<8x384xf32> to vector<8x128xf32>
    %86 = vector.extract_strided_slice %76 {offsets = [0, 128], sizes = [8, 128], strides = [1, 1]} : vector<8x384xf32> to vector<8x128xf32>
    %87 = arith.addf %85, %86 : vector<8x128xf32>
    %88 = arith.negf %87 : vector<8x128xf32>
    %89 = math.exp %88 : vector<8x128xf32>
    %cst_34 = arith.constant 1.000000e+00 : f32
    %90 = vector.broadcast %cst_34 : f32 to vector<8x128xf32>
    %91 = arith.addf %90, %89 : vector<8x128xf32>
    %92 = arith.divf %90, %91 : vector<8x128xf32>
    %93 = vector.extract_strided_slice %75 {offsets = [0, 256], sizes = [8, 128], strides = [1, 1]} : vector<8x384xf32> to vector<8x128xf32>
    %94 = vector.extract_strided_slice %76 {offsets = [0, 256], sizes = [8, 128], strides = [1, 1]} : vector<8x384xf32> to vector<8x128xf32>
    %95 = arith.addf %94, %6 : vector<8x128xf32>
    %96 = arith.mulf %84, %95 : vector<8x128xf32>
    %97 = arith.addf %93, %96 : vector<8x128xf32>
    %98 = math.tanh %97 : vector<8x128xf32>
    %99 = arith.subf %73, %98 : vector<8x128xf32>
    %100 = arith.mulf %92, %99 : vector<8x128xf32>
    %101 = arith.addf %98, %100 : vector<8x128xf32>
    %c0_35 = arith.constant 0 : index
    %c0_36 = arith.constant 0 : index
    %102 = vector.load %arg6[%c0_35, %c0_36] : memref<8x128xf32, #tpu.memory_space<vmem>>, vector<8x128xf32>
    tpu.vector_store %arg6[%c0_35, %c0_36], %101 {strides = array<i32>} : memref<8x128xf32, #tpu.memory_space<vmem>>, vector<8x128xf32>,
    %c2_37 = arith.constant 2 : index
    %c0_38 = arith.constant 0 : index
    %c0_39 = arith.constant 0 : index
    %103 = vector.load %arg4[%c2_37, %c0_38, %c0_39] : memref<8x8x128xf32, #tpu.memory_space<vmem>>, vector<1x8x128xf32>
    %104 = vector.shape_cast %103 : vector<1x8x128xf32> to vector<8x128xf32>
    %105 = vector.shape_cast %101 : vector<8x128xf32> to vector<1x8x128xf32>
    tpu.vector_store %arg4[%c2_37, %c0_38, %c0_39], %105 {strides = array<i32>} : memref<8x8x128xf32, #tpu.memory_space<vmem>>, vector<1x8x128xf32>,
    %c0_40 = arith.constant 0 : index
    %c0_41 = arith.constant 0 : index
    %106 = vector.load %arg6[%c0_40, %c0_41] : memref<8x128xf32, #tpu.memory_space<vmem>>, vector<8x128xf32>
    %c3 = arith.constant 3 : index
    %c0_42 = arith.constant 0 : index
    %c0_43 = arith.constant 0 : index
    %107 = vector.load %arg1[%c3, %c0_42, %c0_43] : memref<8x8x384xf32, #tpu.memory_space<vmem>>, vector<1x8x384xf32>
    %108 = vector.shape_cast %107 : vector<1x8x384xf32> to vector<8x384xf32>
    %cst_44 = arith.constant dense<0.000000e+00> : vector<8x384xf32>
    %109 = tpu.matmul %106, %3, %cst_44 {dimension_numbers = #tpu.dot_dimension_numbers<[1], [0], [0], [1], [0, 0, 1, 1], [], []>} : vector<8x128xf32>, vector<128x384xf32>, vector<8x384xf32> -> vector<8x384xf32>
    %110 = vector.extract_strided_slice %108 {offsets = [0, 0], sizes = [8, 128], strides = [1, 1]} : vector<8x384xf32> to vector<8x128xf32>
    %111 = vector.extract_strided_slice %109 {offsets = [0, 0], sizes = [8, 128], strides = [1, 1]} : vector<8x384xf32> to vector<8x128xf32>
    %112 = arith.addf %110, %111 : vector<8x128xf32>
    %113 = arith.negf %112 : vector<8x128xf32>
    %114 = math.exp %113 : vector<8x128xf32>
    %cst_45 = arith.constant 1.000000e+00 : f32
    %115 = vector.broadcast %cst_45 : f32 to vector<8x128xf32>
    %116 = arith.addf %115, %114 : vector<8x128xf32>
    %117 = arith.divf %115, %116 : vector<8x128xf32>
    %118 = vector.extract_strided_slice %108 {offsets = [0, 128], sizes = [8, 128], strides = [1, 1]} : vector<8x384xf32> to vector<8x128xf32>
    %119 = vector.extract_strided_slice %109 {offsets = [0, 128], sizes = [8, 128], strides = [1, 1]} : vector<8x384xf32> to vector<8x128xf32>
    %120 = arith.addf %118, %119 : vector<8x128xf32>
    %121 = arith.negf %120 : vector<8x128xf32>
    %122 = math.exp %121 : vector<8x128xf32>
    %cst_46 = arith.constant 1.000000e+00 : f32
    %123 = vector.broadcast %cst_46 : f32 to vector<8x128xf32>
    %124 = arith.addf %123, %122 : vector<8x128xf32>
    %125 = arith.divf %123, %124 : vector<8x128xf32>
    %126 = vector.extract_strided_slice %108 {offsets = [0, 256], sizes = [8, 128], strides = [1, 1]} : vector<8x384xf32> to vector<8x128xf32>
    %127 = vector.extract_strided_slice %109 {offsets = [0, 256], sizes = [8, 128], strides = [1, 1]} : vector<8x384xf32> to vector<8x128xf32>
    %128 = arith.addf %127, %6 : vector<8x128xf32>
    %129 = arith.mulf %117, %128 : vector<8x128xf32>
    %130 = arith.addf %126, %129 : vector<8x128xf32>
    %131 = math.tanh %130 : vector<8x128xf32>
    %132 = arith.subf %106, %131 : vector<8x128xf32>
    %133 = arith.mulf %125, %132 : vector<8x128xf32>
    %134 = arith.addf %131, %133 : vector<8x128xf32>
    %c0_47 = arith.constant 0 : index
    %c0_48 = arith.constant 0 : index
    %135 = vector.load %arg6[%c0_47, %c0_48] : memref<8x128xf32, #tpu.memory_space<vmem>>, vector<8x128xf32>
    tpu.vector_store %arg6[%c0_47, %c0_48], %134 {strides = array<i32>} : memref<8x128xf32, #tpu.memory_space<vmem>>, vector<8x128xf32>,
    %c3_49 = arith.constant 3 : index
    %c0_50 = arith.constant 0 : index
    %c0_51 = arith.constant 0 : index
    %136 = vector.load %arg4[%c3_49, %c0_50, %c0_51] : memref<8x8x128xf32, #tpu.memory_space<vmem>>, vector<1x8x128xf32>
    %137 = vector.shape_cast %136 : vector<1x8x128xf32> to vector<8x128xf32>
    %138 = vector.shape_cast %134 : vector<8x128xf32> to vector<1x8x128xf32>
    tpu.vector_store %arg4[%c3_49, %c0_50, %c0_51], %138 {strides = array<i32>} : memref<8x8x128xf32, #tpu.memory_space<vmem>>, vector<1x8x128xf32>,
    %c0_52 = arith.constant 0 : index
    %c0_53 = arith.constant 0 : index
    %139 = vector.load %arg6[%c0_52, %c0_53] : memref<8x128xf32, #tpu.memory_space<vmem>>, vector<8x128xf32>
    %c4 = arith.constant 4 : index
    %c0_54 = arith.constant 0 : index
    %c0_55 = arith.constant 0 : index
    %140 = vector.load %arg1[%c4, %c0_54, %c0_55] : memref<8x8x384xf32, #tpu.memory_space<vmem>>, vector<1x8x384xf32>
    %141 = vector.shape_cast %140 : vector<1x8x384xf32> to vector<8x384xf32>
    %cst_56 = arith.constant dense<0.000000e+00> : vector<8x384xf32>
    %142 = tpu.matmul %139, %3, %cst_56 {dimension_numbers = #tpu.dot_dimension_numbers<[1], [0], [0], [1], [0, 0, 1, 1], [], []>} : vector<8x128xf32>, vector<128x384xf32>, vector<8x384xf32> -> vector<8x384xf32>
    %143 = vector.extract_strided_slice %141 {offsets = [0, 0], sizes = [8, 128], strides = [1, 1]} : vector<8x384xf32> to vector<8x128xf32>
    %144 = vector.extract_strided_slice %142 {offsets = [0, 0], sizes = [8, 128], strides = [1, 1]} : vector<8x384xf32> to vector<8x128xf32>
    %145 = arith.addf %143, %144 : vector<8x128xf32>
    %146 = arith.negf %145 : vector<8x128xf32>
    %147 = math.exp %146 : vector<8x128xf32>
    %cst_57 = arith.constant 1.000000e+00 : f32
    %148 = vector.broadcast %cst_57 : f32 to vector<8x128xf32>
    %149 = arith.addf %148, %147 : vector<8x128xf32>
    %150 = arith.divf %148, %149 : vector<8x128xf32>
    %151 = vector.extract_strided_slice %141 {offsets = [0, 128], sizes = [8, 128], strides = [1, 1]} : vector<8x384xf32> to vector<8x128xf32>
    %152 = vector.extract_strided_slice %142 {offsets = [0, 128], sizes = [8, 128], strides = [1, 1]} : vector<8x384xf32> to vector<8x128xf32>
    %153 = arith.addf %151, %152 : vector<8x128xf32>
    %154 = arith.negf %153 : vector<8x128xf32>
    %155 = math.exp %154 : vector<8x128xf32>
    %cst_58 = arith.constant 1.000000e+00 : f32
    %156 = vector.broadcast %cst_58 : f32 to vector<8x128xf32>
    %157 = arith.addf %156, %155 : vector<8x128xf32>
    %158 = arith.divf %156, %157 : vector<8x128xf32>
    %159 = vector.extract_strided_slice %141 {offsets = [0, 256], sizes = [8, 128], strides = [1, 1]} : vector<8x384xf32> to vector<8x128xf32>
    %160 = vector.extract_strided_slice %142 {offsets = [0, 256], sizes = [8, 128], strides = [1, 1]} : vector<8x384xf32> to vector<8x128xf32>
    %161 = arith.addf %160, %6 : vector<8x128xf32>
    %162 = arith.mulf %150, %161 : vector<8x128xf32>
    %163 = arith.addf %159, %162 : vector<8x128xf32>
    %164 = math.tanh %163 : vector<8x128xf32>
    %165 = arith.subf %139, %164 : vector<8x128xf32>
    %166 = arith.mulf %158, %165 : vector<8x128xf32>
    %167 = arith.addf %164, %166 : vector<8x128xf32>
    %c0_59 = arith.constant 0 : index
    %c0_60 = arith.constant 0 : index
    %168 = vector.load %arg6[%c0_59, %c0_60] : memref<8x128xf32, #tpu.memory_space<vmem>>, vector<8x128xf32>
    tpu.vector_store %arg6[%c0_59, %c0_60], %167 {strides = array<i32>} : memref<8x128xf32, #tpu.memory_space<vmem>>, vector<8x128xf32>,
    %c4_61 = arith.constant 4 : index
    %c0_62 = arith.constant 0 : index
    %c0_63 = arith.constant 0 : index
    %169 = vector.load %arg4[%c4_61, %c0_62, %c0_63] : memref<8x8x128xf32, #tpu.memory_space<vmem>>, vector<1x8x128xf32>
    %170 = vector.shape_cast %169 : vector<1x8x128xf32> to vector<8x128xf32>
    %171 = vector.shape_cast %167 : vector<8x128xf32> to vector<1x8x128xf32>
    tpu.vector_store %arg4[%c4_61, %c0_62, %c0_63], %171 {strides = array<i32>} : memref<8x8x128xf32, #tpu.memory_space<vmem>>, vector<1x8x128xf32>,
    %c0_64 = arith.constant 0 : index
    %c0_65 = arith.constant 0 : index
    %172 = vector.load %arg6[%c0_64, %c0_65] : memref<8x128xf32, #tpu.memory_space<vmem>>, vector<8x128xf32>
    %c5 = arith.constant 5 : index
    %c0_66 = arith.constant 0 : index
    %c0_67 = arith.constant 0 : index
    %173 = vector.load %arg1[%c5, %c0_66, %c0_67] : memref<8x8x384xf32, #tpu.memory_space<vmem>>, vector<1x8x384xf32>
    %174 = vector.shape_cast %173 : vector<1x8x384xf32> to vector<8x384xf32>
    %cst_68 = arith.constant dense<0.000000e+00> : vector<8x384xf32>
    %175 = tpu.matmul %172, %3, %cst_68 {dimension_numbers = #tpu.dot_dimension_numbers<[1], [0], [0], [1], [0, 0, 1, 1], [], []>} : vector<8x128xf32>, vector<128x384xf32>, vector<8x384xf32> -> vector<8x384xf32>
    %176 = vector.extract_strided_slice %174 {offsets = [0, 0], sizes = [8, 128], strides = [1, 1]} : vector<8x384xf32> to vector<8x128xf32>
    %177 = vector.extract_strided_slice %175 {offsets = [0, 0], sizes = [8, 128], strides = [1, 1]} : vector<8x384xf32> to vector<8x128xf32>
    %178 = arith.addf %176, %177 : vector<8x128xf32>
    %179 = arith.negf %178 : vector<8x128xf32>
    %180 = math.exp %179 : vector<8x128xf32>
    %cst_69 = arith.constant 1.000000e+00 : f32
    %181 = vector.broadcast %cst_69 : f32 to vector<8x128xf32>
    %182 = arith.addf %181, %180 : vector<8x128xf32>
    %183 = arith.divf %181, %182 : vector<8x128xf32>
    %184 = vector.extract_strided_slice %174 {offsets = [0, 128], sizes = [8, 128], strides = [1, 1]} : vector<8x384xf32> to vector<8x128xf32>
    %185 = vector.extract_strided_slice %175 {offsets = [0, 128], sizes = [8, 128], strides = [1, 1]} : vector<8x384xf32> to vector<8x128xf32>
    %186 = arith.addf %184, %185 : vector<8x128xf32>
    %187 = arith.negf %186 : vector<8x128xf32>
    %188 = math.exp %187 : vector<8x128xf32>
    %cst_70 = arith.constant 1.000000e+00 : f32
    %189 = vector.broadcast %cst_70 : f32 to vector<8x128xf32>
    %190 = arith.addf %189, %188 : vector<8x128xf32>
    %191 = arith.divf %189, %190 : vector<8x128xf32>
    %192 = vector.extract_strided_slice %174 {offsets = [0, 256], sizes = [8, 128], strides = [1, 1]} : vector<8x384xf32> to vector<8x128xf32>
    %193 = vector.extract_strided_slice %175 {offsets = [0, 256], sizes = [8, 128], strides = [1, 1]} : vector<8x384xf32> to vector<8x128xf32>
    %194 = arith.addf %193, %6 : vector<8x128xf32>
    %195 = arith.mulf %183, %194 : vector<8x128xf32>
    %196 = arith.addf %192, %195 : vector<8x128xf32>
    %197 = math.tanh %196 : vector<8x128xf32>
    %198 = arith.subf %172, %197 : vector<8x128xf32>
    %199 = arith.mulf %191, %198 : vector<8x128xf32>
    %200 = arith.addf %197, %199 : vector<8x128xf32>
    %c0_71 = arith.constant 0 : index
    %c0_72 = arith.constant 0 : index
    %201 = vector.load %arg6[%c0_71, %c0_72] : memref<8x128xf32, #tpu.memory_space<vmem>>, vector<8x128xf32>
    tpu.vector_store %arg6[%c0_71, %c0_72], %200 {strides = array<i32>} : memref<8x128xf32, #tpu.memory_space<vmem>>, vector<8x128xf32>,
    %c5_73 = arith.constant 5 : index
    %c0_74 = arith.constant 0 : index
    %c0_75 = arith.constant 0 : index
    %202 = vector.load %arg4[%c5_73, %c0_74, %c0_75] : memref<8x8x128xf32, #tpu.memory_space<vmem>>, vector<1x8x128xf32>
    %203 = vector.shape_cast %202 : vector<1x8x128xf32> to vector<8x128xf32>
    %204 = vector.shape_cast %200 : vector<8x128xf32> to vector<1x8x128xf32>
    tpu.vector_store %arg4[%c5_73, %c0_74, %c0_75], %204 {strides = array<i32>} : memref<8x8x128xf32, #tpu.memory_space<vmem>>, vector<1x8x128xf32>,
    %c0_76 = arith.constant 0 : index
    %c0_77 = arith.constant 0 : index
    %205 = vector.load %arg6[%c0_76, %c0_77] : memref<8x128xf32, #tpu.memory_space<vmem>>, vector<8x128xf32>
    %c6 = arith.constant 6 : index
    %c0_78 = arith.constant 0 : index
    %c0_79 = arith.constant 0 : index
    %206 = vector.load %arg1[%c6, %c0_78, %c0_79] : memref<8x8x384xf32, #tpu.memory_space<vmem>>, vector<1x8x384xf32>
    %207 = vector.shape_cast %206 : vector<1x8x384xf32> to vector<8x384xf32>
    %cst_80 = arith.constant dense<0.000000e+00> : vector<8x384xf32>
    %208 = tpu.matmul %205, %3, %cst_80 {dimension_numbers = #tpu.dot_dimension_numbers<[1], [0], [0], [1], [0, 0, 1, 1], [], []>} : vector<8x128xf32>, vector<128x384xf32>, vector<8x384xf32> -> vector<8x384xf32>
    %209 = vector.extract_strided_slice %207 {offsets = [0, 0], sizes = [8, 128], strides = [1, 1]} : vector<8x384xf32> to vector<8x128xf32>
    %210 = vector.extract_strided_slice %208 {offsets = [0, 0], sizes = [8, 128], strides = [1, 1]} : vector<8x384xf32> to vector<8x128xf32>
    %211 = arith.addf %209, %210 : vector<8x128xf32>
    %212 = arith.negf %211 : vector<8x128xf32>
    %213 = math.exp %212 : vector<8x128xf32>
    %cst_81 = arith.constant 1.000000e+00 : f32
    %214 = vector.broadcast %cst_81 : f32 to vector<8x128xf32>
    %215 = arith.addf %214, %213 : vector<8x128xf32>
    %216 = arith.divf %214, %215 : vector<8x128xf32>
    %217 = vector.extract_strided_slice %207 {offsets = [0, 128], sizes = [8, 128], strides = [1, 1]} : vector<8x384xf32> to vector<8x128xf32>
    %218 = vector.extract_strided_slice %208 {offsets = [0, 128], sizes = [8, 128], strides = [1, 1]} : vector<8x384xf32> to vector<8x128xf32>
    %219 = arith.addf %217, %218 : vector<8x128xf32>
    %220 = arith.negf %219 : vector<8x128xf32>
    %221 = math.exp %220 : vector<8x128xf32>
    %cst_82 = arith.constant 1.000000e+00 : f32
    %222 = vector.broadcast %cst_82 : f32 to vector<8x128xf32>
    %223 = arith.addf %222, %221 : vector<8x128xf32>
    %224 = arith.divf %222, %223 : vector<8x128xf32>
    %225 = vector.extract_strided_slice %207 {offsets = [0, 256], sizes = [8, 128], strides = [1, 1]} : vector<8x384xf32> to vector<8x128xf32>
    %226 = vector.extract_strided_slice %208 {offsets = [0, 256], sizes = [8, 128], strides = [1, 1]} : vector<8x384xf32> to vector<8x128xf32>
    %227 = arith.addf %226, %6 : vector<8x128xf32>
    %228 = arith.mulf %216, %227 : vector<8x128xf32>
    %229 = arith.addf %225, %228 : vector<8x128xf32>
    %230 = math.tanh %229 : vector<8x128xf32>
    %231 = arith.subf %205, %230 : vector<8x128xf32>
    %232 = arith.mulf %224, %231 : vector<8x128xf32>
    %233 = arith.addf %230, %232 : vector<8x128xf32>
    %c0_83 = arith.constant 0 : index
    %c0_84 = arith.constant 0 : index
    %234 = vector.load %arg6[%c0_83, %c0_84] : memref<8x128xf32, #tpu.memory_space<vmem>>, vector<8x128xf32>
    tpu.vector_store %arg6[%c0_83, %c0_84], %233 {strides = array<i32>} : memref<8x128xf32, #tpu.memory_space<vmem>>, vector<8x128xf32>,
    %c6_85 = arith.constant 6 : index
    %c0_86 = arith.constant 0 : index
    %c0_87 = arith.constant 0 : index
    %235 = vector.load %arg4[%c6_85, %c0_86, %c0_87] : memref<8x8x128xf32, #tpu.memory_space<vmem>>, vector<1x8x128xf32>
    %236 = vector.shape_cast %235 : vector<1x8x128xf32> to vector<8x128xf32>
    %237 = vector.shape_cast %233 : vector<8x128xf32> to vector<1x8x128xf32>
    tpu.vector_store %arg4[%c6_85, %c0_86, %c0_87], %237 {strides = array<i32>} : memref<8x8x128xf32, #tpu.memory_space<vmem>>, vector<1x8x128xf32>,
    %c0_88 = arith.constant 0 : index
    %c0_89 = arith.constant 0 : index
    %238 = vector.load %arg6[%c0_88, %c0_89] : memref<8x128xf32, #tpu.memory_space<vmem>>, vector<8x128xf32>
    %c7 = arith.constant 7 : index
    %c0_90 = arith.constant 0 : index
    %c0_91 = arith.constant 0 : index
    %239 = vector.load %arg1[%c7, %c0_90, %c0_91] : memref<8x8x384xf32, #tpu.memory_space<vmem>>, vector<1x8x384xf32>
    %240 = vector.shape_cast %239 : vector<1x8x384xf32> to vector<8x384xf32>
    %cst_92 = arith.constant dense<0.000000e+00> : vector<8x384xf32>
    %241 = tpu.matmul %238, %3, %cst_92 {dimension_numbers = #tpu.dot_dimension_numbers<[1], [0], [0], [1], [0, 0, 1, 1], [], []>} : vector<8x128xf32>, vector<128x384xf32>, vector<8x384xf32> -> vector<8x384xf32>
    %242 = vector.extract_strided_slice %240 {offsets = [0, 0], sizes = [8, 128], strides = [1, 1]} : vector<8x384xf32> to vector<8x128xf32>
    %243 = vector.extract_strided_slice %241 {offsets = [0, 0], sizes = [8, 128], strides = [1, 1]} : vector<8x384xf32> to vector<8x128xf32>
    %244 = arith.addf %242, %243 : vector<8x128xf32>
    %245 = arith.negf %244 : vector<8x128xf32>
    %246 = math.exp %245 : vector<8x128xf32>
    %cst_93 = arith.constant 1.000000e+00 : f32
    %247 = vector.broadcast %cst_93 : f32 to vector<8x128xf32>
    %248 = arith.addf %247, %246 : vector<8x128xf32>
    %249 = arith.divf %247, %248 : vector<8x128xf32>
    %250 = vector.extract_strided_slice %240 {offsets = [0, 128], sizes = [8, 128], strides = [1, 1]} : vector<8x384xf32> to vector<8x128xf32>
    %251 = vector.extract_strided_slice %241 {offsets = [0, 128], sizes = [8, 128], strides = [1, 1]} : vector<8x384xf32> to vector<8x128xf32>
    %252 = arith.addf %250, %251 : vector<8x128xf32>
    %253 = arith.negf %252 : vector<8x128xf32>
    %254 = math.exp %253 : vector<8x128xf32>
    %cst_94 = arith.constant 1.000000e+00 : f32
    %255 = vector.broadcast %cst_94 : f32 to vector<8x128xf32>
    %256 = arith.addf %255, %254 : vector<8x128xf32>
    %257 = arith.divf %255, %256 : vector<8x128xf32>
    %258 = vector.extract_strided_slice %240 {offsets = [0, 256], sizes = [8, 128], strides = [1, 1]} : vector<8x384xf32> to vector<8x128xf32>
    %259 = vector.extract_strided_slice %241 {offsets = [0, 256], sizes = [8, 128], strides = [1, 1]} : vector<8x384xf32> to vector<8x128xf32>
    %260 = arith.addf %259, %6 : vector<8x128xf32>
    %261 = arith.mulf %249, %260 : vector<8x128xf32>
    %262 = arith.addf %258, %261 : vector<8x128xf32>
    %263 = math.tanh %262 : vector<8x128xf32>
    %264 = arith.subf %238, %263 : vector<8x128xf32>
    %265 = arith.mulf %257, %264 : vector<8x128xf32>
    %266 = arith.addf %263, %265 : vector<8x128xf32>
    %c0_95 = arith.constant 0 : index
    %c0_96 = arith.constant 0 : index
    %267 = vector.load %arg6[%c0_95, %c0_96] : memref<8x128xf32, #tpu.memory_space<vmem>>, vector<8x128xf32>
    tpu.vector_store %arg6[%c0_95, %c0_96], %266 {strides = array<i32>} : memref<8x128xf32, #tpu.memory_space<vmem>>, vector<8x128xf32>,
    %c7_97 = arith.constant 7 : index
    %c0_98 = arith.constant 0 : index
    %c0_99 = arith.constant 0 : index
    %268 = vector.load %arg4[%c7_97, %c0_98, %c0_99] : memref<8x8x128xf32, #tpu.memory_space<vmem>>, vector<1x8x128xf32>
    %269 = vector.shape_cast %268 : vector<1x8x128xf32> to vector<8x128xf32>
    %270 = vector.shape_cast %266 : vector<8x128xf32> to vector<1x8x128xf32>
    tpu.vector_store %arg4[%c7_97, %c0_98, %c0_99], %270 {strides = array<i32>} : memref<8x8x128xf32, #tpu.memory_space<vmem>>, vector<1x8x128xf32>,
    %c0_i32_100 = arith.constant 0 : i32
    %271 = arith.cmpi eq, %arg0, %c0_i32_100 : i32
    %272 = arith.extui %271 : i1 to i32
    %c0_i32_101 = arith.constant 0 : i32
    %273 = arith.cmpi ne, %272, %c0_i32_101 : i32
    scf.if %273 {
      %c0_102 = arith.constant 0 : index
      %c0_103 = arith.constant 0 : index
      %274 = vector.load %arg6[%c0_102, %c0_103] : memref<8x128xf32, #tpu.memory_space<vmem>>, vector<8x128xf32>
      %c0_104 = arith.constant 0 : index
      %c0_105 = arith.constant 0 : index
      %275 = vector.load %arg5[%c0_104, %c0_105] : memref<8x128xf32, #tpu.memory_space<vmem>>, vector<8x128xf32>
      tpu.vector_store %arg5[%c0_104, %c0_105], %274 {strides = array<i32>} : memref<8x128xf32, #tpu.memory_space<vmem>>, vector<8x128xf32>,
    } else {
    }
    return
  }
  func.func @transform_0(%arg0: i32) -> (i32, i32, i32) {
    %c0_i32 = arith.constant 0 : i32
    %c0_i32_0 = arith.constant 0 : i32
    %c0_i32_1 = arith.constant 0 : i32
    return %arg0, %c0_i32, %c0_i32_0 : i32, i32, i32
  }
  func.func @transform_1(%arg0: i32) -> (i32, i32) {
    %c0_i32 = arith.constant 0 : i32
    %c0_i32_0 = arith.constant 0 : i32
    %c0_i32_1 = arith.constant 0 : i32
    return %c0_i32, %c0_i32_0 : i32, i32
  }
  func.func @transform_2(%arg0: i32) -> (i32, i32) {
    %c0_i32 = arith.constant 0 : i32
    %c0_i32_0 = arith.constant 0 : i32
    %c0_i32_1 = arith.constant 0 : i32
    return %c0_i32, %c0_i32_0 : i32, i32
  }
  func.func @transform_3(%arg0: i32) -> (i32, i32, i32) {
    %c0_i32 = arith.constant 0 : i32
    %c0_i32_0 = arith.constant 0 : i32
    %c0_i32_1 = arith.constant 0 : i32
    return %arg0, %c0_i32, %c0_i32_0 : i32, i32, i32
  }
  func.func @transform_4(%arg0: i32) -> (i32, i32) {
    %c0_i32 = arith.constant 0 : i32
    %c0_i32_0 = arith.constant 0 : i32
    %c0_i32_1 = arith.constant 0 : i32
    return %c0_i32, %c0_i32_0 : i32, i32
  }
}

</mosaic_0001>

<bundles_post_ra>
// kernel: tpu_custom_call.1
= control target key start
LH: loop header
LB: loop body
LE: loop exit
PB: predicated region body
PF: predicated region fallthrough
CT: control target
= control target key end

     0   :  { %10 = vsyncpa [#allocation4], 0  ;;  %s1900_s0 = inlined_call_operand.hbm [shape: f32[8,8,384], index: 0, kind: input, shape index: {}]   ;;  %s1901_s1 = inlined_call_operand.hbm [shape: f32[128,384], index: 1, kind: input, shape index: {}]   ;;  %s1902_s2 = inlined_call_operand.vmem [shape: f32[1,128], index: 2, kind: input, shape index: {}]   ;;  %s1903_s3 = inlined_call_operand.hbm [shape: f32[8,8,128], index: 3, kind: output, shape index: {0}]   ;;  %s1904_s4 = inlined_call_operand.hbm [shape: f32[8,128], index: 4, kind: output, shape index: {1}]  }
   0x1   :  { %11 = vsyncpa [#allocation7], 0 }
   0x2   :  { %12 = vsyncpa [#allocation5], 0 }
   0x3   :  { %13 = vsyncpa [#allocation10], 0  ;;  %s18_s17 = sshll.u32 %s1900_s0, 4  ;;  %s1325_s18 = smov [#allocation3]   ;;  %s19_s17 = int_to_ptr.hbm [resolvable:$true] %s18_s17 }
   0x4   :  { %s20_s19 = sshll.u32 %s1325_s18, 4  ;;  %s31_s22 = sshll.u32 %s1901_s1, 4  ;;  %s21_s19 = int_to_ptr.vmem [resolvable:$true] %s20_s19  ;;  %s32_s22 = int_to_ptr.hbm [resolvable:$true] %s31_s22 }
   0x5   :  { %s1326_s23 = smov 384   ;;  %s1327_s24 = smov 24  }
   0x6   :  { %26 = dma.hbm_to_vmem [thread:$0]  %s19_s17, 3072, %s21_s19, [#allocation4], %s1326_s23, %s1326_s23, %s1327_s24  }
   0x7   :  { %s1328_s25 = smov [#allocation6]  }
   0x8   :  { %s33_s26 = sshll.u32 %s1328_s25, 4  ;;  %s34_s26 = int_to_ptr.vmem [resolvable:$true] %s33_s26 }
   0x9   :  { %39 = dma.hbm_to_vmem [thread:$0]  %s32_s22, 6144, %s34_s26, [#allocation7], %s1326_s23, %s1326_s23, %s1327_s24  }
   0xa   :  { %1317 = dma.done.wait [#allocation4], 3072  }
   0xb   :  { %1318 = vsyncadd [#allocation4], 4294964224 }
   0xc   :  { %1319 = dma.done.wait [#allocation7], 6144  }
   0xd   :  { %1320 = vsyncadd [#allocation7], 4294961152  ;;  %v1365_v0 = vld [vmem:[#allocation6 + $0x168] sm:$0xff]  ;;  %v1367_v1 = vld [vmem:[#allocation6 + $0x170] sm:$0xff]  ;;  %v1329_v44 = vmov 0.0   ;;  %s1036_s6 = sshll.u32 %s1903_s3, 4  ;;  %s1037_s6 = int_to_ptr.hbm [resolvable:$true] %s1036_s6 }
   0xe   :  { %v1369_v2 = vld [vmem:[#allocation6 + $0x150] sm:$0xff]  ;;  %111 = vmatpush.msra.mxu0 %v1365_v0  ;;  %131 = vmatpush.msra.mxu1 %v1367_v1  ;;  %v1373_v3 = vld [vmem:[#allocation6 + $0x158] sm:$0xff]  ;;  %v1377_v5 = vld [vmem:[#allocation6 + $0x140] sm:$0xff]  ;;  %s1331_s7 = smov [#allocation9]   ;;  %s1050_s11 = sshll.u32 %s1904_s4, 4  ;;  %s1051_s11 = int_to_ptr.hbm [resolvable:$true] %s1050_s11 }
   0xf   :  { %v1375_v4 = vld [vmem:[#allocation6 + $0x138] sm:$0xff]  ;;  %225 = vmatpush.msra.mxu3 %v1365_v0  ;;  %v1382_v6 = vld [vmem:[#allocation6 + $0x120] sm:$0xff]  ;;  %v1384_v7 = vld [vmem:[#allocation6 + $0x128] sm:$0xff]  ;;  %s1048_s8 = sshll.u32 %s1331_s7, 4  ;;  %s1332_s12 = smov 128   ;;  %s1049_s8 = int_to_ptr.vmem [resolvable:$true] %s1048_s8 }
  0x10   :  { %112 = vmatpush.msra.mxu0 %v1369_v2  ;;  %132 = vmatpush.msra.mxu1 %v1373_v3  ;;  %v1389_v8 = vld [vmem:[#allocation6 + $0x108] sm:$0xff]  ;;  %v1391_v9 = vld [vmem:[#allocation6 + $0x110] sm:$0xff]  ;;  %v1398_v11 = vld [vmem:[#allocation6 + $0xf8] sm:$0xff]  ;;  %s1333_s13 = smov 8  }
  0x11   :  { %226 = vmatpush.msra.mxu3 %v1369_v2  ;;  %v1396_v10 = vld [vmem:[#allocation6 + $0xf0] sm:$0xff]  ;;  %v1400_v12 = vld [vmem:[#allocation6 + $0x178] sm:$0xff]  ;;  %v1405_v13 = vld [vmem:[#allocation6 + $0x160] sm:$0xff] }
  0x12   :  { %113 = vmatpush.msra.mxu0 %v1375_v4  ;;  %133 = vmatpush.msra.mxu1 %v1377_v5  ;;  %v1407_v14 = vld [vmem:[#allocation6 + $0xd8] sm:$0xff]  ;;  %v1409_v15 = vld [vmem:[#allocation6 + $0xe0] sm:$0xff]  ;;  %v1415_v16 = vld [vmem:[#allocation6 + $0x148] sm:$0xff] }
  0x13   :  { %227 = vmatpush.msra.mxu3 %v1375_v4  ;;  %151 = vmatpush.msra.mxu2 %v1400_v12  ;;  %v1417_v17 = vld [vmem:[#allocation6 + $0xc0] sm:$0xff]  ;;  %v1419_v18 = vld [vmem:[#allocation6 + $0xc8] sm:$0xff]  ;;  %v1425_v19 = vld [vmem:[#allocation6 + $0x130] sm:$0xff] }
  0x14   :  { %114 = vmatpush.msra.mxu0 %v1382_v6  ;;  %134 = vmatpush.msra.mxu1 %v1384_v7  ;;  %v1427_v20 = vld [vmem:[#allocation6 + $0xa8] sm:$0xff]  ;;  %v1429_v21 = vld [vmem:[#allocation6 + $0xb0] sm:$0xff]  ;;  %v1435_v22 = vld [vmem:[#allocation6 + $0x118] sm:$0xff] }
  0x15   :  { %228 = vmatpush.msra.mxu3 %v1382_v6  ;;  %152 = vmatpush.msra.mxu2 %v1405_v13  ;;  %v1437_v23 = vld [vmem:[#allocation6 + $0x90] sm:$0xff]  ;;  %v1439_v24 = vld [vmem:[#allocation6 + $0x98] sm:$0xff]  ;;  %v1445_v25 = vld [vmem:[#allocation6 + $0x100] sm:$0xff] }
  0x16   :  { %115 = vmatpush.msra.mxu0 %v1389_v8  ;;  %135 = vmatpush.msra.mxu1 %v1391_v9  ;;  %v1447_v26 = vld [vmem:[#allocation6 + $0x78] sm:$0xff]  ;;  %v1449_v27 = vld [vmem:[#allocation6 + $0x80] sm:$0xff]  ;;  %v1455_v28 = vld [vmem:[#allocation6 + $0xe8] sm:$0xff] }
  0x17   :  { %229 = vmatpush.msra.mxu3 %v1389_v8  ;;  %153 = vmatpush.msra.mxu2 %v1415_v16  ;;  %v1457_v29 = vld [vmem:[#allocation6 + $0x60] sm:$0xff]  ;;  %v1459_v30 = vld [vmem:[#allocation6 + $0x68] sm:$0xff]  ;;  %v1465_v31 = vld [vmem:[#allocation6 + $0xd0] sm:$0xff] }
  0x18   :  { %116 = vmatpush.msra.mxu0 %v1396_v10  ;;  %136 = vmatpush.msra.mxu1 %v1398_v11  ;;  %v1467_v32 = vld [vmem:[#allocation6 + $0x48] sm:$0xff]  ;;  %v1469_v33 = vld [vmem:[#allocation6 + $0x50] sm:$0xff]  ;;  %v1475_v34 = vld [vmem:[#allocation6 + $0xb8] sm:$0xff] }
  0x19   :  { %230 = vmatpush.msra.mxu3 %v1396_v10  ;;  %154 = vmatpush.msra.mxu2 %v1425_v19  ;;  %v1477_v35 = vld [vmem:[#allocation6 + $0x30] sm:$0xff]  ;;  %v1479_v36 = vld [vmem:[#allocation6 + $0x38] sm:$0xff]  ;;  %v1485_v37 = vld [vmem:[#allocation6 + $0xa0] sm:$0xff] }
  0x1a   :  { %117 = vmatpush.msra.mxu0 %v1407_v14  ;;  %137 = vmatpush.msra.mxu1 %v1409_v15  ;;  %1921 = vst [vmem:[#allocation15_spill] sm:$0xff] %v1477_v35  ;;  %v1487_v38 = vld [vmem:[#allocation6 + $0x18] sm:$0xff]  ;;  %v1489_v39 = vld [vmem:[#allocation6 + $0x20] sm:$0xff]  ;;  %v1495_v40 = vld [vmem:[#allocation6 + $0x88] sm:$0xff] }
  0x1b   :  { %231 = vmatpush.msra.mxu3 %v1407_v14  ;;  %155 = vmatpush.msra.mxu2 %v1435_v22  ;;  %1922 = vst [vmem:[#allocation16_spill] sm:$0xff] %v1479_v36  ;;  %v1497_v41 = vld [vmem:[#allocation6] sm:$0xff]  ;;  %v1499_v42 = vld [vmem:[#allocation6 + $0x8] sm:$0xff]  ;;  %v1506_v43 = vld [vmem:[#allocation6 + $0x70] sm:$0xff] }
  0x1c   :  { %118 = vmatpush.msra.mxu0 %v1417_v17  ;;  %138 = vmatpush.msra.mxu1 %v1419_v18  ;;  %1923 = vst [vmem:[#allocation17_spill] sm:$0xff] %v1487_v38  ;;  %v1511_v45 = vld [vmem:[#allocation6 + $0x58] sm:$0xff]  ;;  %v1515_v46 = vld [vmem:[#allocation6 + $0x40] sm:$0xff]  ;;  %v1521_v47 = vld [vmem:[#allocation6 + $0x28] sm:$0xff] }
  0x1d   :  { %232 = vmatpush.msra.mxu3 %v1417_v17  ;;  %156 = vmatpush.msra.mxu2 %v1445_v25  ;;  %1924 = vst [vmem:[#allocation18_spill] sm:$0xff] %v1489_v39  ;;  %v1527_v48 = vld [vmem:[#allocation6 + $0x10] sm:$0xff]  ;;  %v108_v49 = vld [vmem:[#allocation3] sm:$0xff]  ;;  %v109_v50 = vld [vmem:[#allocation3 + $0x8] sm:$0xff] }
  0x1e   :  { %119 = vmatpush.msra.mxu0 %v1427_v20  ;;  %139 = vmatpush.msra.mxu1 %v1429_v21  ;;  %1925 = vst [vmem:[#allocation19_spill] sm:$0xff] %v1497_v41 }
  0x1f   :  { %233 = vmatpush.msra.mxu3 %v1427_v20  ;;  %157 = vmatpush.msra.mxu2 %v1455_v28  ;;  %1926 = vst [vmem:[#allocation20_spill] sm:$0xff] %v1499_v42 }
  0x20   :  { %120 = vmatpush.msra.mxu0 %v1437_v23  ;;  %140 = vmatpush.msra.mxu1 %v1439_v24  ;;  %1927 = vst [vmem:[#allocation21_spill] sm:$0xff] %v1521_v47 }
  0x21   :  { %234 = vmatpush.msra.mxu3 %v1437_v23  ;;  %158 = vmatpush.msra.mxu2 %v1465_v31  ;;  %1928 = vst [vmem:[#allocation22_spill] sm:$0xff] %v1527_v48 }
  0x22   :  { %121 = vmatpush.msra.mxu0 %v1447_v26  ;;  %141 = vmatpush.msra.mxu1 %v1449_v27 }
  0x23   :  { %235 = vmatpush.msra.mxu3 %v1447_v26  ;;  %159 = vmatpush.msra.mxu2 %v1475_v34 }
  0x24   :  { %122 = vmatpush.msra.mxu0 %v1457_v29  ;;  %142 = vmatpush.msra.mxu1 %v1459_v30 }
  0x25   :  { %236 = vmatpush.msra.mxu3 %v1457_v29  ;;  %160 = vmatpush.msra.mxu2 %v1485_v37 }
  0x26   :  { %123 = vmatpush.msra.mxu0 %v1467_v32  ;;  %143 = vmatpush.msra.mxu1 %v1469_v33 }
  0x27   :  { %237 = vmatpush.msra.mxu3 %v1467_v32  ;;  %161 = vmatpush.msra.mxu2 %v1495_v40 }
  0x28   :  { %124 = vmatpush.msra.mxu0 %v1477_v35  ;;  %144 = vmatpush.msra.mxu1 %v1479_v36 }
  0x29   :  { %238 = vmatpush.msra.mxu3 %v1477_v35  ;;  %162 = vmatpush.msra.mxu2 %v1506_v43 }
  0x2a   :  { %125 = vmatpush.msra.mxu0 %v1487_v38  ;;  %145 = vmatpush.msra.mxu1 %v1489_v39 }
  0x2b   :  { %239 = vmatpush.msra.mxu3 %v1487_v38  ;;  %163 = vmatpush.msra.mxu2 %v1511_v45 }
  0x2c   :  { %126 = vmatpush.msra.mxu0 %v1497_v41  ;;  %146 = vmatpush.msra.mxu1 %v1499_v42 }
  0x2d   :  { %127 = vmatmul.f32.vlgmr.msra.gmra.mxu0 %v1329_v44  ;;  %147 = vmatmul.f32.vlgmr.msra.gmra.mxu1 %v1329_v44 }
  0x2e   :  { %245 = vmatpush.msrb.mxu0 %v1367_v1  ;;  %265 = vmatpush.msrb.mxu1 %v1400_v12 }
  0x2f   :  { %240 = vmatpush.msra.mxu3 %v1497_v41  ;;  %164 = vmatpush.msra.mxu2 %v1515_v46 }
  0x30   :  { %246 = vmatpush.msrb.mxu0 %v1373_v3  ;;  %266 = vmatpush.msrb.mxu1 %v1405_v13 }
  0x31   :  { %360 = vmatpush.msrb.mxu3 %v1367_v1  ;;  %165 = vmatpush.msra.mxu2 %v1521_v47 }
  0x32   :  { %247 = vmatpush.msrb.mxu0 %v1377_v5  ;;  %267 = vmatpush.msrb.mxu1 %v1415_v16 }
  0x33   :  { %361 = vmatpush.msrb.mxu3 %v1373_v3  ;;  %166 = vmatpush.msra.mxu2 %v1527_v48 }
  0x34   :  { %248 = vmatpush.msrb.mxu0 %v1384_v7  ;;  %268 = vmatpush.msrb.mxu1 %v1425_v19 }
  0x35   :  { %362 = vmatpush.msrb.mxu3 %v1377_v5  ;;  %167 = vmatmul.f32.vlgmr.msra.gmra.mxu2 %v1329_v44  ;;  %v1640_v44 = vld [vmem:[%s1902_s2] ss:$0 sm:$0xff] }
  0x36   :  { %249 = vmatpush.msrb.mxu0 %v1391_v9  ;;  %269 = vmatpush.msrb.mxu1 %v1435_v22 }
  0x37   :  { %340 = vmatpush.msrb.mxu2 %v1365_v0  ;;  %363 = vmatpush.msrb.mxu3 %v1384_v7 }
  0x38   :  { %250 = vmatpush.msrb.mxu0 %v1398_v11  ;;  %270 = vmatpush.msrb.mxu1 %v1445_v25 }
  0x39   :  { %341 = vmatpush.msrb.mxu2 %v1369_v2  ;;  %364 = vmatpush.msrb.mxu3 %v1391_v9 }
  0x3a   :  { %251 = vmatpush.msrb.mxu0 %v1409_v15  ;;  %271 = vmatpush.msrb.mxu1 %v1455_v28 }
  0x3b   :  { %342 = vmatpush.msrb.mxu2 %v1375_v4  ;;  %365 = vmatpush.msrb.mxu3 %v1398_v11 }
  0x3c   :  { %252 = vmatpush.msrb.mxu0 %v1419_v18  ;;  %272 = vmatpush.msrb.mxu1 %v1465_v31 }
  0x3d   :  { %343 = vmatpush.msrb.mxu2 %v1382_v6  ;;  %366 = vmatpush.msrb.mxu3 %v1409_v15 }
  0x3e   :  { %253 = vmatpush.msrb.mxu0 %v1429_v21  ;;  %273 = vmatpush.msrb.mxu1 %v1475_v34 }
  0x3f   :  { %344 = vmatpush.msrb.mxu2 %v1389_v8  ;;  %367 = vmatpush.msrb.mxu3 %v1419_v18 }
  0x40   :  { %254 = vmatpush.msrb.mxu0 %v1439_v24  ;;  %274 = vmatpush.msrb.mxu1 %v1485_v37 }
  0x41   :  { %345 = vmatpush.msrb.mxu2 %v1396_v10  ;;  %368 = vmatpush.msrb.mxu3 %v1429_v21 }
  0x42   :  { %255 = vmatpush.msrb.mxu0 %v1449_v27  ;;  %275 = vmatpush.msrb.mxu1 %v1495_v40 }
  0x43   :  { %346 = vmatpush.msrb.mxu2 %v1407_v14  ;;  %369 = vmatpush.msrb.mxu3 %v1439_v24 }
  0x44   :  { %256 = vmatpush.msrb.mxu0 %v1459_v30  ;;  %276 = vmatpush.msrb.mxu1 %v1506_v43 }
  0x45   :  { %347 = vmatpush.msrb.mxu2 %v1417_v17  ;;  %370 = vmatpush.msrb.mxu3 %v1449_v27 }
  0x46   :  { %257 = vmatpush.msrb.mxu0 %v1469_v33  ;;  %277 = vmatpush.msrb.mxu1 %v1511_v45 }
  0x47   :  { %348 = vmatpush.msrb.mxu2 %v1427_v20  ;;  %371 = vmatpush.msrb.mxu3 %v1459_v30 }
  0x48   :  { %258 = vmatpush.msrb.mxu0 %v1479_v36  ;;  %278 = vmatpush.msrb.mxu1 %v1515_v46 }
  0x49   :  { %349 = vmatpush.msrb.mxu2 %v1437_v23  ;;  %372 = vmatpush.msrb.mxu3 %v1469_v33 }
  0x4a   :  { %259 = vmatpush.msrb.mxu0 %v1489_v39  ;;  %279 = vmatpush.msrb.mxu1 %v1521_v47 }
  0x4b   :  { %350 = vmatpush.msrb.mxu2 %v1447_v26  ;;  %373 = vmatpush.msrb.mxu3 %v1479_v36 }
  0x4c   :  { %260 = vmatpush.msrb.mxu0 %v1499_v42  ;;  %280 = vmatpush.msrb.mxu1 %v1527_v48 }
  0x4d   :  { %351 = vmatpush.msrb.mxu2 %v1457_v29  ;;  %374 = vmatpush.msrb.mxu3 %v1489_v39 }
  0x4e   :  { %380 = vmatpush.msra.mxu0 %v1400_v12  ;;  %455 = vmatpush.msra.mxu1 %v1365_v0 }
  0x4f   :  { %352 = vmatpush.msrb.mxu2 %v1467_v32  ;;  %375 = vmatpush.msrb.mxu3 %v1499_v42 }
  0x50   :  { %381 = vmatpush.msra.mxu0 %v1405_v13  ;;  %456 = vmatpush.msra.mxu1 %v1369_v2 }
  0x51   :  { %353 = vmatpush.msrb.mxu2 %v1477_v35 }
  0x52   :  { %382 = vmatpush.msra.mxu0 %v1415_v16  ;;  %457 = vmatpush.msra.mxu1 %v1375_v4 }
  0x53   :  { %354 = vmatpush.msrb.mxu2 %v1487_v38 }
  0x54   :  { %383 = vmatpush.msra.mxu0 %v1425_v19  ;;  %458 = vmatpush.msra.mxu1 %v1382_v6 }
  0x55   :  { %355 = vmatpush.msrb.mxu2 %v1497_v41 }
  0x56   :  { %384 = vmatpush.msra.mxu0 %v1435_v22  ;;  %459 = vmatpush.msra.mxu1 %v1389_v8 }
  0x57   :  { %475 = vmatpush.msra.mxu2 %v1367_v1 }
  0x58   :  { %385 = vmatpush.msra.mxu0 %v1445_v25  ;;  %460 = vmatpush.msra.mxu1 %v1396_v10 }
  0x59   :  { %476 = vmatpush.msra.mxu2 %v1373_v3 }
  0x5a   :  { %386 = vmatpush.msra.mxu0 %v1455_v28  ;;  %461 = vmatpush.msra.mxu1 %v1407_v14 }
  0x5b   :  { %477 = vmatpush.msra.mxu2 %v1377_v5 }
  0x5c   :  { %387 = vmatpush.msra.mxu0 %v1465_v31  ;;  %462 = vmatpush.msra.mxu1 %v1417_v17 }
  0x5d   :  { %478 = vmatpush.msra.mxu2 %v1384_v7 }
  0x5e   :  { %388 = vmatpush.msra.mxu0 %v1475_v34  ;;  %463 = vmatpush.msra.mxu1 %v1427_v20 }
  0x5f   :  { %479 = vmatpush.msra.mxu2 %v1391_v9 }
  0x60   :  { %389 = vmatpush.msra.mxu0 %v1485_v37  ;;  %464 = vmatpush.msra.mxu1 %v1437_v23 }
  0x61   :  { %480 = vmatpush.msra.mxu2 %v1398_v11 }
  0x62   :  { %390 = vmatpush.msra.mxu0 %v1495_v40  ;;  %465 = vmatpush.msra.mxu1 %v1447_v26 }
  0x63   :  { %481 = vmatpush.msra.mxu2 %v1409_v15 }
  0x64   :  { %391 = vmatpush.msra.mxu0 %v1506_v43  ;;  %466 = vmatpush.msra.mxu1 %v1457_v29 }
  0x65   :  { %482 = vmatpush.msra.mxu2 %v1419_v18 }
  0x66   :  { %392 = vmatpush.msra.mxu0 %v1511_v45  ;;  %467 = vmatpush.msra.mxu1 %v1467_v32 }
  0x67   :  { %483 = vmatpush.msra.mxu2 %v1429_v21 }
  0x68   :  { %393 = vmatpush.msra.mxu0 %v1515_v46  ;;  %468 = vmatpush.msra.mxu1 %v1477_v35 }
  0x69   :  { %484 = vmatpush.msra.mxu2 %v1439_v24 }
  0x6a   :  { %394 = vmatpush.msra.mxu0 %v1521_v47  ;;  %469 = vmatpush.msra.mxu1 %v1487_v38 }
  0x6b   :  { %485 = vmatpush.msra.mxu2 %v1449_v27 }
  0x6c   :  { %395 = vmatpush.msra.mxu0 %v1527_v48  ;;  %470 = vmatpush.msra.mxu1 %v1497_v41  ;;  %v110_v41 = vld [vmem:[#allocation3 + $0x10] sm:$0xff] }
  0x6d   :  { %486 = vmatpush.msra.mxu2 %v1459_v30 }
  0x6f   :  { %487 = vmatpush.msra.mxu2 %v1469_v33 }
  0x71   :  { %488 = vmatpush.msra.mxu2 %v1479_v36 }
  0x73   :  { %489 = vmatpush.msra.mxu2 %v1489_v39 }
  0x75   :  { %490 = vmatpush.msra.mxu2 %v1499_v42 }
  0xaa   :  { %v128_v51 = vpop.f32.mrf.mxu0  ;;  %v148_v52 = vpop.f32.mrf.mxu1 }
  0xab   :  { %v171_v53 = vadd.f32 %v128_v51, %v108_v49  ;;  %v191_v54 = vadd.f32 %v148_v52, %v109_v50 }
  0xad   :  { %v1066_v55 = vmul.f32 -1.442695, %v171_v53  ;;  %v1067_v56 = vmul.f32 -1.442695, %v191_v54 }
  0xaf   :  { %1092 = vpow2.f32 %v1066_v55 }
  0xb0   :  { %1094 = vpow2.f32 %v1067_v56 }
  0xb5   :  { %v1093_v57 = vpop.eup %1092 }
  0xb6   :  { %v1095_v58 = vpop.eup %1094  ;;  %v175_v59 = vadd.f32 1.0, %v1093_v57 }
  0xb7   :  { %v195_v60 = vadd.f32 1.0, %v1095_v58 }
  0xb8   :  { %1096 = vrcp.f32 %v175_v59  ;;  %v168_v51 = vpop.f32.mrf.mxu2  ;;  %v187_v52 = vand.u32 2147483648, %v175_v59  ;;  %v185_v54 = vand.u32 2147483647, %v175_v59  ;;  %vm181_vm1 = vweird.f32 %v175_v59 }
  0xb9   :  { %1098 = vrcp.f32 %v195_v60  ;;  %v211_v56 = vadd.f32 %v1640_v44, %v168_v51  ;;  %vm201_vm4 = vweird.f32 %v195_v60  ;;  %v207_v47 = vand.u32 2147483648, %v195_v60 }
  0xba   :  { %v188_v58 = vor.u32 1.1754944e-38, %v187_v52  ;;  %vm186_vm3 = vcmp.eq.f32.partialorder %v185_v54, 8.507059e+37  ;;  %v205_v36 = vand.u32 2147483647, %v195_v60 }
  0xbc   :  { %vm206_vm7 = vcmp.eq.f32.partialorder %v205_v36, 8.507059e+37  ;;  %v1929_v36 = vld [vmem:[#allocation16_spill] sm:$0xff] }
  0xbe   :  { %v1097_v61 = vpop.eup %1096 }
  0xbf   :  { %v1099_v62 = vpop.eup %1098  ;;  %v177_v63 = vmul.f32 %v1097_v61, %v175_v59  ;;  %vm182_vm0 = vweird.f32 %v1097_v61  ;;  %v208_v59 = vor.u32 1.1754944e-38, %v207_v47  ;;  %v1934_v47 = vld [vmem:[#allocation19_spill] sm:$0xff] }
  0xc0   :  { %v197_v50 = vmul.f32 %v1099_v62, %v195_v60  ;;  %vm183_vm2 = vmor %vm181_vm1, %vm182_vm0  ;;  %vm202_vm5 = vweird.f32 %v1099_v62  ;;  %v223_v60 = vld [vmem:[#allocation3 + $0x20] sm:$0xff] }
  0xc1   :  { %v178_v49 = vsub.f32 1.0, %v177_v63  ;;  %vm203_vm6 = vmor %vm201_vm4, %vm202_vm5 }
  0xc2   :  { %v198_v57 = vsub.f32 1.0, %v197_v50 }
  0xc3   :  { %v179_v53 = vmul.f32 %v1097_v61, %v178_v49 }
  0xc4   :  { %v199_v38 = vmul.f32 %v1099_v62, %v198_v57  ;;  %v222_v57 = vld [vmem:[#allocation3 + $0x18] sm:$0xff] }
  0xc5   :  { %v180_v55 = vadd.f32 %v1097_v61, %v179_v53 }
  0xc6   :  { %v200_v49 = vadd.f32 %v1099_v62, %v199_v38  ;;  %v1930_v38 = vld [vmem:[#allocation21_spill] sm:$0xff] }
  0xc7   :  { %v184_v42 = vsel %vm183_vm2, %v1097_v61, %v180_v55 }
  0xc8   :  { %v189_v48 = vsel %vm186_vm3, %v188_v58, %v184_v42  ;;  %v204_v51 = vsel %vm203_vm6, %v1099_v62, %v200_v49  ;;  %v1933_v42 = vld [vmem:[#allocation22_spill] sm:$0xff] }
  0xc9   :  { %v212_v39 = vmul.f32 %v211_v56, %v189_v48  ;;  %v209_v52 = vsel %vm206_vm7, %v208_v59, %v204_v51  ;;  %v1935_v48 = vld [vmem:[#allocation20_spill] sm:$0xff] }
  0xcb   :  { %v213_v63 = vadd.f32 %v212_v39, %v110_v41  ;;  %v1931_v39 = vld [vmem:[#allocation17_spill] sm:$0xff]  ;;  %v1932_v41 = vld [vmem:[#allocation18_spill] sm:$0xff] }
  0xcd   :  { %1100 = vtanh.f32 %v213_v63 }
  0xd3   :  { %v1101_v50 = vpop.eup %1100 }
  0xd4   :  { %v215_v53 = vsub.f32 0.0, %v1101_v50 }
  0xd6   :  { %v216_v61 = vmul.f32 %v215_v53, %v209_v52 }
  0xd8   :  { %v1643_v54 = vadd.f32 %v1101_v50, %v216_v61 }
  0xda   :  { %219 = vst [vmem:[#allocation8] sm:$0xff] %v1643_v54  ;;  %241 = vmatmul.f32.vlgmr.msra.gmra.mxu3 %v1643_v54  ;;  %261 = vmatmul.f32.vlgmr.msrb.gmra.mxu0 %v1643_v54 }
  0xdb   :  { %281 = vmatmul.f32.vlgmr.msrb.gmra.mxu1 %v1643_v54  ;;  %495 = vmatpush.msra.mxu3 %v1400_v12 }
  0xdc   :  { %570 = vmatpush.msrb.mxu0 %v1365_v0  ;;  %590 = vmatpush.msrb.mxu1 %v1367_v1 }
  0xdd   :  { %496 = vmatpush.msra.mxu3 %v1405_v13 }
  0xde   :  { %571 = vmatpush.msrb.mxu0 %v1369_v2  ;;  %591 = vmatpush.msrb.mxu1 %v1373_v3 }
  0xdf   :  { %497 = vmatpush.msra.mxu3 %v1415_v16 }
  0xe0   :  { %572 = vmatpush.msrb.mxu0 %v1375_v4  ;;  %592 = vmatpush.msrb.mxu1 %v1377_v5 }
  0xe1   :  { %498 = vmatpush.msra.mxu3 %v1425_v19 }
  0xe2   :  { %573 = vmatpush.msrb.mxu0 %v1382_v6  ;;  %593 = vmatpush.msrb.mxu1 %v1384_v7 }
  0xe3   :  { %499 = vmatpush.msra.mxu3 %v1435_v22 }
  0xe4   :  { %574 = vmatpush.msrb.mxu0 %v1389_v8  ;;  %594 = vmatpush.msrb.mxu1 %v1391_v9 }
  0xe5   :  { %500 = vmatpush.msra.mxu3 %v1445_v25 }
  0xe6   :  { %575 = vmatpush.msrb.mxu0 %v1396_v10  ;;  %595 = vmatpush.msrb.mxu1 %v1398_v11 }
  0xe7   :  { %501 = vmatpush.msra.mxu3 %v1455_v28 }
  0xe8   :  { %576 = vmatpush.msrb.mxu0 %v1407_v14  ;;  %596 = vmatpush.msrb.mxu1 %v1409_v15 }
  0xe9   :  { %502 = vmatpush.msra.mxu3 %v1465_v31 }
  0xea   :  { %577 = vmatpush.msrb.mxu0 %v1417_v17  ;;  %597 = vmatpush.msrb.mxu1 %v1419_v18 }
  0xeb   :  { %503 = vmatpush.msra.mxu3 %v1475_v34 }
  0xec   :  { %578 = vmatpush.msrb.mxu0 %v1427_v20  ;;  %598 = vmatpush.msrb.mxu1 %v1429_v21 }
  0xed   :  { %504 = vmatpush.msra.mxu3 %v1485_v37 }
  0xee   :  { %579 = vmatpush.msrb.mxu0 %v1437_v23  ;;  %599 = vmatpush.msrb.mxu1 %v1439_v24 }
  0xef   :  { %505 = vmatpush.msra.mxu3 %v1495_v40 }
  0xf0   :  { %580 = vmatpush.msrb.mxu0 %v1447_v26  ;;  %600 = vmatpush.msrb.mxu1 %v1449_v27 }
  0xf1   :  { %506 = vmatpush.msra.mxu3 %v1506_v43 }
  0xf2   :  { %581 = vmatpush.msrb.mxu0 %v1457_v29  ;;  %601 = vmatpush.msrb.mxu1 %v1459_v30 }
  0xf3   :  { %507 = vmatpush.msra.mxu3 %v1511_v45 }
  0xf4   :  { %582 = vmatpush.msrb.mxu0 %v1467_v32  ;;  %602 = vmatpush.msrb.mxu1 %v1469_v33 }
  0xf5   :  { %508 = vmatpush.msra.mxu3 %v1515_v46 }
  0xf6   :  { %583 = vmatpush.msrb.mxu0 %v1477_v35  ;;  %603 = vmatpush.msrb.mxu1 %v1929_v36 }
  0xf7   :  { %509 = vmatpush.msra.mxu3 %v1930_v38 }
  0xf8   :  { %584 = vmatpush.msrb.mxu0 %v1931_v39  ;;  %604 = vmatpush.msrb.mxu1 %v1932_v41 }
  0xf9   :  { %510 = vmatpush.msra.mxu3 %v1933_v42 }
  0xfa   :  { %585 = vmatpush.msrb.mxu0 %v1934_v47  ;;  %605 = vmatpush.msrb.mxu1 %v1935_v48 }
 0x157   :  { %v262_v62 = vpop.f32.mrf.mxu0 }
 0x158   :  { %v305_v55 = vadd.f32 %v262_v62, %v223_v60 }
 0x15a   :  { %v1069_v56 = vmul.f32 -1.442695, %v305_v55  ;;  %v282_v55 = vpop.f32.mrf.mxu1 }
 0x15c   :  { %1102 = vpow2.f32 %v1069_v56 }
 0x15d   :  { %v242_v58 = vpop.f32.mrf.mxu3 }
 0x15e   :  { %v285_v63 = vadd.f32 %v242_v58, %v222_v57 }
 0x160   :  { %v1068_v49 = vmul.f32 -1.442695, %v285_v63  ;;  %v325_v63 = vadd.f32 %v1640_v44, %v282_v55 }
 0x162   :  { %1104 = vpow2.f32 %v1068_v49  ;;  %v1103_v59 = vpop.eup %1102 }
 0x163   :  { %v309_v50 = vadd.f32 1.0, %v1103_v59 }
 0x165   :  { %vm315_vm13 = vweird.f32 %v309_v50  ;;  %v319_v35 = vand.u32 2147483647, %v309_v50 }
 0x167   :  { %vm320_vm15 = vcmp.eq.f32.partialorder %v319_v35, 8.507059e+37  ;;  %v1936_v35 = vld [vmem:[#allocation15_spill] sm:$0xff] }
 0x168   :  { %v1105_v51 = vpop.eup %1104 }
 0x169   :  { %v289_v53 = vadd.f32 1.0, %v1105_v51  ;;  %v224_v51 = vld [vmem:[#allocation3 + $0x28] sm:$0xff] }
 0x16b   :  { %1106 = vrcp.f32 %v289_v53  ;;  %v301_v41 = vand.u32 2147483648, %v289_v53  ;;  %v299_v62 = vand.u32 2147483647, %v289_v53  ;;  %vm295_vm9 = vweird.f32 %v289_v53 }
 0x16c   :  { %1108 = vrcp.f32 %v309_v50 }
 0x16d   :  { %v302_v58 = vor.u32 1.1754944e-38, %v301_v41  ;;  %vm300_vm11 = vcmp.eq.f32.partialorder %v299_v62, 8.507059e+37 }
 0x171   :  { %v1107_v52 = vpop.eup %1106 }
 0x172   :  { %v1109_v61 = vpop.eup %1108  ;;  %v291_v47 = vmul.f32 %v1107_v52, %v289_v53  ;;  %vm296_vm8 = vweird.f32 %v1107_v52 }
 0x173   :  { %v311_v42 = vmul.f32 %v1109_v61, %v309_v50  ;;  %vm297_vm10 = vmor %vm295_vm9, %vm296_vm8  ;;  %vm316_vm12 = vweird.f32 %v1109_v61 }
 0x174   :  { %v292_v48 = vsub.f32 1.0, %v291_v47  ;;  %vm317_vm14 = vmor %vm315_vm13, %vm316_vm12 }
 0x175   :  { %v312_v56 = vsub.f32 1.0, %v311_v42 }
 0x176   :  { %v293_v60 = vmul.f32 %v1107_v52, %v292_v48  ;;  %v321_v48 = vand.u32 2147483648, %v309_v50  ;;  %v1941_v50 = vld [vmem:[#allocation22_spill] sm:$0xff] }
 0x177   :  { %v313_v38 = vmul.f32 %v1109_v61, %v312_v56  ;;  %v337_v56 = vld [vmem:[#allocation3 + $0x30] sm:$0xff] }
 0x178   :  { %v294_v57 = vadd.f32 %v1107_v52, %v293_v60  ;;  %v322_v60 = vor.u32 1.1754944e-38, %v321_v48 }
 0x179   :  { %v314_v36 = vadd.f32 %v1109_v61, %v313_v38  ;;  %v1939_v38 = vld [vmem:[#allocation17_spill] sm:$0xff] }
 0x17a   :  { %v298_v49 = vsel %vm297_vm10, %v1107_v52, %v294_v57  ;;  %v1943_v57 = vld [vmem:[#allocation20_spill] sm:$0xff] }
 0x17b   :  { %v303_v59 = vsel %vm300_vm11, %v302_v58, %v298_v49  ;;  %v318_v53 = vsel %vm317_vm14, %v1109_v61, %v314_v36  ;;  %v1938_v36 = vld [vmem:[#allocation21_spill] sm:$0xff]  ;;  %v1942_v61 = vld [vmem:[#allocation19_spill] sm:$0xff] }
 0x17c   :  { %v326_v39 = vmul.f32 %v325_v63, %v303_v59  ;;  %v323_v52 = vsel %vm320_vm15, %v322_v60, %v318_v53  ;;  %v338_v58 = vld [vmem:[#allocation3 + $0x38] sm:$0xff] }
 0x17e   :  { %v327_v47 = vadd.f32 %v326_v39, %v224_v51  ;;  %v1940_v39 = vld [vmem:[#allocation18_spill] sm:$0xff] }
 0x180   :  { %1110 = vtanh.f32 %v327_v47 }
 0x186   :  { %v1111_v42 = vpop.eup %1110 }
 0x187   :  { %v329_v41 = vsub.f32 %v1643_v54, %v1111_v42  ;;  %v1937_v54 = vld [vmem:[#allocation16_spill] sm:$0xff] }
 0x189   :  { %v330_v62 = vmul.f32 %v329_v41, %v323_v52 }
 0x18b   :  { %v1699_v55 = vadd.f32 %v1111_v42, %v330_v62 }
 0x18d   :  { %334 = vst [vmem:[#allocation8 + $0x8] sm:$0xff] %v1699_v55  ;;  %356 = vmatmul.f32.vlgmr.msrb.gmra.mxu2 %v1699_v55  ;;  %376 = vmatmul.f32.vlgmr.msrb.gmra.mxu3 %v1699_v55 }
 0x18e   :  { %396 = vmatmul.f32.vlgmr.msra.gmra.mxu0 %v1699_v55  ;;  %610 = vmatpush.msrb.mxu2 %v1400_v12 }
 0x18f   :  { %685 = vmatpush.msrb.mxu3 %v1365_v0  ;;  %705 = vmatpush.msra.mxu0 %v1367_v1 }
 0x190   :  { %611 = vmatpush.msrb.mxu2 %v1405_v13 }
 0x191   :  { %686 = vmatpush.msrb.mxu3 %v1369_v2  ;;  %706 = vmatpush.msra.mxu0 %v1373_v3 }
 0x192   :  { %612 = vmatpush.msrb.mxu2 %v1415_v16 }
 0x193   :  { %687 = vmatpush.msrb.mxu3 %v1375_v4  ;;  %707 = vmatpush.msra.mxu0 %v1377_v5 }
 0x194   :  { %613 = vmatpush.msrb.mxu2 %v1425_v19 }
 0x195   :  { %688 = vmatpush.msrb.mxu3 %v1382_v6  ;;  %708 = vmatpush.msra.mxu0 %v1384_v7 }
 0x196   :  { %614 = vmatpush.msrb.mxu2 %v1435_v22 }
 0x197   :  { %689 = vmatpush.msrb.mxu3 %v1389_v8  ;;  %709 = vmatpush.msra.mxu0 %v1391_v9 }
 0x198   :  { %615 = vmatpush.msrb.mxu2 %v1445_v25 }
 0x199   :  { %690 = vmatpush.msrb.mxu3 %v1396_v10  ;;  %710 = vmatpush.msra.mxu0 %v1398_v11 }
 0x19a   :  { %616 = vmatpush.msrb.mxu2 %v1455_v28 }
 0x19b   :  { %691 = vmatpush.msrb.mxu3 %v1407_v14  ;;  %711 = vmatpush.msra.mxu0 %v1409_v15 }
 0x19c   :  { %617 = vmatpush.msrb.mxu2 %v1465_v31 }
 0x19d   :  { %692 = vmatpush.msrb.mxu3 %v1417_v17  ;;  %712 = vmatpush.msra.mxu0 %v1419_v18 }
 0x19e   :  { %618 = vmatpush.msrb.mxu2 %v1475_v34 }
 0x19f   :  { %693 = vmatpush.msrb.mxu3 %v1427_v20  ;;  %713 = vmatpush.msra.mxu0 %v1429_v21 }
 0x1a0   :  { %619 = vmatpush.msrb.mxu2 %v1485_v37 }
 0x1a1   :  { %694 = vmatpush.msrb.mxu3 %v1437_v23  ;;  %714 = vmatpush.msra.mxu0 %v1439_v24 }
 0x1a2   :  { %620 = vmatpush.msrb.mxu2 %v1495_v40 }
 0x1a3   :  { %695 = vmatpush.msrb.mxu3 %v1447_v26  ;;  %715 = vmatpush.msra.mxu0 %v1449_v27 }
 0x1a4   :  { %621 = vmatpush.msrb.mxu2 %v1506_v43 }
 0x1a5   :  { %696 = vmatpush.msrb.mxu3 %v1457_v29  ;;  %716 = vmatpush.msra.mxu0 %v1459_v30 }
 0x1a6   :  { %622 = vmatpush.msrb.mxu2 %v1511_v45 }
 0x1a7   :  { %697 = vmatpush.msrb.mxu3 %v1467_v32  ;;  %717 = vmatpush.msra.mxu0 %v1469_v33 }
 0x1a8   :  { %623 = vmatpush.msrb.mxu2 %v1515_v46 }
 0x1a9   :  { %698 = vmatpush.msrb.mxu3 %v1936_v35  ;;  %718 = vmatpush.msra.mxu0 %v1937_v54 }
 0x1aa   :  { %624 = vmatpush.msrb.mxu2 %v1938_v36 }
 0x1ab   :  { %699 = vmatpush.msrb.mxu3 %v1939_v38  ;;  %719 = vmatpush.msra.mxu0 %v1940_v39 }
 0x1ac   :  { %625 = vmatpush.msrb.mxu2 %v1941_v50 }
 0x1ad   :  { %700 = vmatpush.msrb.mxu3 %v1942_v61  ;;  %720 = vmatpush.msra.mxu0 %v1943_v57 }
 0x210   :  { %v357_v63 = vpop.f32.mrf.mxu2  ;;  %v377_v49 = vpop.f32.mrf.mxu3 }
 0x211   :  { %v400_v59 = vadd.f32 %v357_v63, %v337_v56  ;;  %v420_v51 = vadd.f32 %v377_v49, %v338_v58  ;;  %v397_v58 = vpop.f32.mrf.mxu0 }
 0x213   :  { %v1070_v47 = vmul.f32 -1.442695, %v400_v59  ;;  %v1071_v48 = vmul.f32 -1.442695, %v420_v51  ;;  %v440_v51 = vadd.f32 %v1640_v44, %v397_v58 }
 0x215   :  { %1112 = vpow2.f32 %v1070_v47 }
 0x216   :  { %1114 = vpow2.f32 %v1071_v48 }
 0x21b   :  { %v1113_v53 = vpop.eup %1112 }
 0x21c   :  { %v1115_v42 = vpop.eup %1114  ;;  %v404_v60 = vadd.f32 1.0, %v1113_v53  ;;  %v339_v53 = vld [vmem:[#allocation3 + $0x40] sm:$0xff] }
 0x21d   :  { %v424_v41 = vadd.f32 1.0, %v1115_v42 }
 0x21e   :  { %1116 = vrcp.f32 %v404_v60  ;;  %v416_v50 = vand.u32 2147483648, %v404_v60  ;;  %v414_v56 = vand.u32 2147483647, %v404_v60  ;;  %vm410_vm1 = vweird.f32 %v404_v60 }
 0x21f   :  { %1118 = vrcp.f32 %v424_v41  ;;  %vm430_vm5 = vweird.f32 %v424_v41  ;;  %v434_v35 = vand.u32 2147483647, %v424_v41 }
 0x220   :  { %v417_v49 = vor.u32 1.1754944e-38, %v416_v50  ;;  %vm415_vm3 = vcmp.eq.f32.partialorder %v414_v56, 8.507059e+37 }
 0x221   :  { %vm435_vm7 = vcmp.eq.f32.partialorder %v434_v35, 8.507059e+37 }
 0x224   :  { %v1117_v52 = vpop.eup %1116 }
 0x225   :  { %v1119_v62 = vpop.eup %1118  ;;  %v406_v61 = vmul.f32 %v1117_v52, %v404_v60  ;;  %vm411_vm0 = vweird.f32 %v1117_v52 }
 0x226   :  { %v426_v39 = vmul.f32 %v1119_v62, %v424_v41  ;;  %vm412_vm2 = vmor %vm410_vm1, %vm411_vm0  ;;  %vm431_vm4 = vweird.f32 %v1119_v62 }
 0x227   :  { %v407_v57 = vsub.f32 1.0, %v406_v61  ;;  %vm432_vm6 = vmor %vm430_vm5, %vm431_vm4 }
 0x228   :  { %v427_v59 = vsub.f32 1.0, %v426_v39 }
 0x229   :  { %v408_v38 = vmul.f32 %v1117_v52, %v407_v57  ;;  %v436_v57 = vand.u32 2147483648, %v424_v41 }
 0x22a   :  { %v428_v36 = vmul.f32 %v1119_v62, %v427_v59 }
 0x22b   :  { %v409_v63 = vadd.f32 %v1117_v52, %v408_v38  ;;  %v437_v50 = vor.u32 1.1754944e-38, %v436_v57  ;;  %v1823_v57 = vld [vmem:[#allocation6 + $0x148] sm:$0xff] }
 0x22c   :  { %v429_v54 = vadd.f32 %v1119_v62, %v428_v36 }
 0x22d   :  { %v413_v47 = vsel %vm412_vm2, %v1117_v52, %v409_v63 }
 0x22e   :  { %v418_v48 = vsel %vm415_vm3, %v417_v49, %v413_v47  ;;  %v433_v38 = vsel %vm432_vm6, %v1119_v62, %v429_v54  ;;  %v1173_v47 = vld [vmem:[#allocation6 + $0x168] sm:$0xff] }
 0x22f   :  { %v441_v42 = vmul.f32 %v440_v51, %v418_v48  ;;  %v438_v52 = vsel %vm435_vm7, %v437_v50, %v433_v38  ;;  %v1817_v51 = vld [vmem:[#allocation6 + $0x178] sm:$0xff]  ;;  %v1174_v48 = vld [vmem:[#allocation6 + $0x170] sm:$0xff] }
 0x230   :  { %v1179_v38 = vld [vmem:[#allocation6 + $0x138] sm:$0xff]  ;;  %v1826_v50 = vld [vmem:[#allocation6 + $0x130] sm:$0xff] }
 0x231   :  { %v442_v61 = vadd.f32 %v441_v42, %v339_v53  ;;  %v1820_v53 = vld [vmem:[#allocation6 + $0x160] sm:$0xff]  ;;  %v1176_v42 = vld [vmem:[#allocation6 + $0x150] sm:$0xff] }
 0x233   :  { %1120 = vtanh.f32 %v442_v61  ;;  %v1177_v61 = vld [vmem:[#allocation6 + $0x158] sm:$0xff] }
 0x239   :  { %v1121_v60 = vpop.eup %1120 }
 0x23a   :  { %v444_v39 = vsub.f32 %v1699_v55, %v1121_v60 }
 0x23c   :  { %v445_v56 = vmul.f32 %v444_v39, %v438_v52  ;;  %v1182_v39 = vld [vmem:[#allocation6 + $0x120] sm:$0xff]  ;;  %v1183_v52 = vld [vmem:[#allocation6 + $0x128] sm:$0xff] }
 0x23e   :  { %v1755_v58 = vadd.f32 %v1121_v60, %v445_v56  ;;  %v1180_v60 = vld [vmem:[#allocation6 + $0x140] sm:$0xff]  ;;  %v1829_v56 = vld [vmem:[#allocation6 + $0x118] sm:$0xff] }
 0x240   :  { %449 = vst [vmem:[#allocation8 + $0x10] sm:$0xff] %v1755_v58  ;;  %471 = vmatmul.f32.vlgmr.msra.gmra.mxu1 %v1755_v58  ;;  %491 = vmatmul.f32.vlgmr.msra.gmra.mxu2 %v1755_v58 }
 0x241   :  { %511 = vmatmul.f32.vlgmr.msra.gmra.mxu3 %v1755_v58  ;;  %725 = vmatpush.msra.mxu1 %v1400_v12  ;;  %v453_v12 = vld [vmem:[#allocation3 + $0x50] sm:$0xff] }
 0x242   :  { %800 = vmatpush.msra.mxu2 %v1365_v0  ;;  %820 = vmatpush.msra.mxu3 %v1367_v1  ;;  %v1944_v0 = vld [vmem:[#allocation15_spill] sm:$0xff]  ;;  %v1945_v1 = vld [vmem:[#allocation16_spill] sm:$0xff] }
 0x243   :  { %726 = vmatpush.msra.mxu1 %v1405_v13 }
 0x244   :  { %801 = vmatpush.msra.mxu2 %v1369_v2  ;;  %821 = vmatpush.msra.mxu3 %v1373_v3  ;;  %v1946_v2 = vld [vmem:[#allocation21_spill] sm:$0xff] }
 0x245   :  { %727 = vmatpush.msra.mxu1 %v1415_v16  ;;  %v1947_v3 = vld [vmem:[#allocation17_spill] sm:$0xff] }
 0x246   :  { %802 = vmatpush.msra.mxu2 %v1375_v4  ;;  %822 = vmatpush.msra.mxu3 %v1377_v5  ;;  %v1948_v4 = vld [vmem:[#allocation18_spill] sm:$0xff] }
 0x247   :  { %728 = vmatpush.msra.mxu1 %v1425_v19  ;;  %v1949_v5 = vld [vmem:[#allocation22_spill] sm:$0xff] }
 0x248   :  { %803 = vmatpush.msra.mxu2 %v1382_v6  ;;  %823 = vmatpush.msra.mxu3 %v1384_v7  ;;  %v1950_v6 = vld [vmem:[#allocation19_spill] sm:$0xff]  ;;  %v1951_v7 = vld [vmem:[#allocation20_spill] sm:$0xff] }
 0x249   :  { %729 = vmatpush.msra.mxu1 %v1435_v22 }
 0x24a   :  { %804 = vmatpush.msra.mxu2 %v1389_v8  ;;  %824 = vmatpush.msra.mxu3 %v1391_v9  ;;  %v452_v8 = vld [vmem:[#allocation3 + $0x48] sm:$0xff] }
 0x24b   :  { %730 = vmatpush.msra.mxu1 %v1445_v25 }
 0x24c   :  { %805 = vmatpush.msra.mxu2 %v1396_v10  ;;  %825 = vmatpush.msra.mxu3 %v1398_v11 }
 0x24d   :  { %731 = vmatpush.msra.mxu1 %v1455_v28 }
 0x24e   :  { %806 = vmatpush.msra.mxu2 %v1407_v14  ;;  %826 = vmatpush.msra.mxu3 %v1409_v15 }
 0x24f   :  { %732 = vmatpush.msra.mxu1 %v1465_v31 }
 0x250   :  { %807 = vmatpush.msra.mxu2 %v1417_v17  ;;  %827 = vmatpush.msra.mxu3 %v1419_v18 }
 0x251   :  { %733 = vmatpush.msra.mxu1 %v1475_v34  ;;  %v454_v34 = vld [vmem:[#allocation3 + $0x58] sm:$0xff] }
 0x252   :  { %808 = vmatpush.msra.mxu2 %v1427_v20  ;;  %828 = vmatpush.msra.mxu3 %v1429_v21 }
 0x253   :  { %734 = vmatpush.msra.mxu1 %v1485_v37 }
 0x254   :  { %809 = vmatpush.msra.mxu2 %v1437_v23  ;;  %829 = vmatpush.msra.mxu3 %v1439_v24 }
 0x255   :  { %735 = vmatpush.msra.mxu1 %v1495_v40 }
 0x256   :  { %810 = vmatpush.msra.mxu2 %v1447_v26  ;;  %830 = vmatpush.msra.mxu3 %v1449_v27 }
 0x257   :  { %736 = vmatpush.msra.mxu1 %v1506_v43 }
 0x258   :  { %811 = vmatpush.msra.mxu2 %v1457_v29  ;;  %831 = vmatpush.msra.mxu3 %v1459_v30 }
 0x259   :  { %737 = vmatpush.msra.mxu1 %v1511_v45 }
 0x25a   :  { %812 = vmatpush.msra.mxu2 %v1467_v32  ;;  %832 = vmatpush.msra.mxu3 %v1469_v33 }
 0x25b   :  { %738 = vmatpush.msra.mxu1 %v1515_v46 }
 0x25c   :  { %813 = vmatpush.msra.mxu2 %v1944_v0  ;;  %833 = vmatpush.msra.mxu3 %v1945_v1  ;;  %v1186_v0 = vld [vmem:[#allocation6 + $0x110] sm:$0xff]  ;;  %v1832_v1 = vld [vmem:[#allocation6 + $0x100] sm:$0xff] }
 0x25d   :  { %739 = vmatpush.msra.mxu1 %v1946_v2  ;;  %v1188_v2 = vld [vmem:[#allocation6 + $0xf0] sm:$0xff] }
 0x25e   :  { %814 = vmatpush.msra.mxu2 %v1947_v3  ;;  %834 = vmatpush.msra.mxu3 %v1948_v4  ;;  %v1189_v3 = vld [vmem:[#allocation6 + $0xf8] sm:$0xff]  ;;  %v1835_v4 = vld [vmem:[#allocation6 + $0xe8] sm:$0xff] }
 0x25f   :  { %740 = vmatpush.msra.mxu1 %v1949_v5  ;;  %v1191_v5 = vld [vmem:[#allocation6 + $0xd8] sm:$0xff] }
 0x260   :  { %815 = vmatpush.msra.mxu2 %v1950_v6  ;;  %835 = vmatpush.msra.mxu3 %v1951_v7  ;;  %v1192_v6 = vld [vmem:[#allocation6 + $0xe0] sm:$0xff]  ;;  %v1838_v7 = vld [vmem:[#allocation6 + $0xd0] sm:$0xff] }
 0x2bd   :  { %v472_v9 = vpop.f32.mrf.mxu1 }
 0x2be   :  { %v515_v10 = vadd.f32 %v472_v9, %v452_v8  ;;  %v1194_v8 = vld [vmem:[#allocation6 + $0xc0] sm:$0xff]  ;;  %v1195_v9 = vld [vmem:[#allocation6 + $0xc8] sm:$0xff] }
 0x2c0   :  { %v1072_v11 = vmul.f32 -1.442695, %v515_v10  ;;  %v1841_v10 = vld [vmem:[#allocation6 + $0xb8] sm:$0xff] }
 0x2c2   :  { %1122 = vpow2.f32 %v1072_v11  ;;  %v1197_v11 = vld [vmem:[#allocation6 + $0xa8] sm:$0xff] }
 0x2c3   :  { %v492_v13 = vpop.f32.mrf.mxu2 }
 0x2c4   :  { %v535_v14 = vadd.f32 %v492_v13, %v453_v12  ;;  %v512_v27 = vpop.f32.mrf.mxu3  ;;  %v1198_v12 = vld [vmem:[#allocation6 + $0xb0] sm:$0xff]  ;;  %v1844_v13 = vld [vmem:[#allocation6 + $0xa0] sm:$0xff] }
 0x2c5   :  { %v555_v33 = vadd.f32 %v1640_v44, %v512_v27  ;;  %v1213_v27 = vld [vmem:[#allocation6 + $0x38] sm:$0xff] }
 0x2c6   :  { %v1073_v15 = vmul.f32 -1.442695, %v535_v14  ;;  %v1200_v14 = vld [vmem:[#allocation6 + $0x90] sm:$0xff] }
 0x2c8   :  { %v1123_v16 = vpop.eup %1122  ;;  %1124 = vpow2.f32 %v1073_v15  ;;  %v1201_v15 = vld [vmem:[#allocation6 + $0x98] sm:$0xff] }
 0x2c9   :  { %v519_v17 = vadd.f32 1.0, %v1123_v16  ;;  %v1847_v16 = vld [vmem:[#allocation6 + $0x88] sm:$0xff] }
 0x2cb   :  { %1126 = vrcp.f32 %v519_v17  ;;  %v531_v23 = vand.u32 2147483648, %v519_v17  ;;  %v529_v25 = vand.u32 2147483647, %v519_v17  ;;  %vm525_vm9 = vweird.f32 %v519_v17 }
 0x2cd   :  { %v532_v30 = vor.u32 1.1754944e-38, %v531_v23  ;;  %vm530_vm11 = vcmp.eq.f32.partialorder %v529_v25, 8.507059e+37  ;;  %v1209_v23 = vld [vmem:[#allocation6 + $0x48] sm:$0xff]  ;;  %v1856_v25 = vld [vmem:[#allocation6 + $0x40] sm:$0xff] }
 0x2ce   :  { %v1125_v18 = vpop.eup %1124 }
 0x2cf   :  { %v539_v19 = vadd.f32 1.0, %v1125_v18  ;;  %v1204_v18 = vld [vmem:[#allocation6 + $0x80] sm:$0xff] }
 0x2d1   :  { %v1127_v20 = vpop.eup %1126  ;;  %1128 = vrcp.f32 %v539_v19  ;;  %v551_v55 = vand.u32 2147483648, %v539_v19  ;;  %vm545_vm13 = vweird.f32 %v539_v19  ;;  %v549_v35 = vand.u32 2147483647, %v539_v19 }
 0x2d2   :  { %v521_v21 = vmul.f32 %v1127_v20, %v519_v17  ;;  %vm526_vm8 = vweird.f32 %v1127_v20  ;;  %v1203_v17 = vld [vmem:[#allocation6 + $0x78] sm:$0xff] }
 0x2d3   :  { %vm527_vm10 = vmor %vm525_vm9, %vm526_vm8  ;;  %v552_v41 = vor.u32 1.1754944e-38, %v551_v55  ;;  %vm550_vm15 = vcmp.eq.f32.partialorder %v549_v35, 8.507059e+37 }
 0x2d4   :  { %v522_v22 = vsub.f32 1.0, %v521_v21  ;;  %v1207_v21 = vld [vmem:[#allocation6 + $0x68] sm:$0xff] }
 0x2d6   :  { %v523_v24 = vmul.f32 %v1127_v20, %v522_v22  ;;  %v1853_v22 = vld [vmem:[#allocation6 + $0x58] sm:$0xff] }
 0x2d7   :  { %v1129_v26 = vpop.eup %1128 }
 0x2d8   :  { %v541_v28 = vmul.f32 %v1129_v26, %v539_v19  ;;  %v524_v29 = vadd.f32 %v1127_v20, %v523_v24  ;;  %vm546_vm12 = vweird.f32 %v1129_v26  ;;  %v1850_v19 = vld [vmem:[#allocation6 + $0x70] sm:$0xff] }
 0x2d9   :  { %vm547_vm14 = vmor %vm545_vm13, %vm546_vm12  ;;  %v1210_v24 = vld [vmem:[#allocation6 + $0x50] sm:$0xff] }
 0x2da   :  { %v542_v31 = vsub.f32 1.0, %v541_v28  ;;  %v528_v32 = vsel %vm527_vm10, %v1127_v20, %v524_v29  ;;  %v1206_v20 = vld [vmem:[#allocation6 + $0x60] sm:$0xff]  ;;  %v1859_v28 = vld [vmem:[#allocation6 + $0x28] sm:$0xff]  ;;  %v1215_v29 = vld [vmem:[#allocation6 + $0x18] sm:$0xff] }
 0x2db   :  { %v533_v37 = vsel %vm530_vm11, %v532_v30, %v528_v32  ;;  %v1216_v30 = vld [vmem:[#allocation6 + $0x20] sm:$0xff] }
 0x2dc   :  { %v556_v40 = vmul.f32 %v555_v33, %v533_v37  ;;  %v543_v43 = vmul.f32 %v1129_v26, %v542_v31  ;;  %v1862_v31 = vld [vmem:[#allocation6 + $0x10] sm:$0xff]  ;;  %v1218_v32 = vld [vmem:[#allocation6] sm:$0xff]  ;;  %v1219_v33 = vld [vmem:[#allocation6 + $0x8] sm:$0xff] }
 0x2dd   :  { %v568_v37 = vld [vmem:[#allocation3 + $0x68] sm:$0xff] }
 0x2de   :  { %v557_v45 = vadd.f32 %v556_v40, %v454_v34  ;;  %v544_v46 = vadd.f32 %v1129_v26, %v543_v43  ;;  %v567_v34 = vld [vmem:[#allocation3 + $0x60] sm:$0xff] }
 0x2e0   :  { %1130 = vtanh.f32 %v557_v45  ;;  %v548_v54 = vsel %vm547_vm14, %v1129_v26, %v544_v46  ;;  %v1212_v26 = vld [vmem:[#allocation6 + $0x30] sm:$0xff] }
 0x2e1   :  { %v553_v63 = vsel %vm550_vm15, %v552_v41, %v548_v54 }
 0x2e6   :  { %v1131_v36 = vpop.eup %1130 }
 0x2e7   :  { %v559_v62 = vsub.f32 %v1755_v58, %v1131_v36  ;;  %v1185_v58 = vld [vmem:[#allocation6 + $0x108] sm:$0xff] }
 0x2e9   :  { %v560_v49 = vmul.f32 %v559_v62, %v553_v63 }
 0x2eb   :  { %v1811_v59 = vadd.f32 %v1131_v36, %v560_v49 }
 0x2ed   :  { %564 = vst [vmem:[#allocation8 + $0x18] sm:$0xff] %v1811_v59  ;;  %586 = vmatmul.f32.vlgmr.msrb.gmra.mxu0 %v1811_v59  ;;  %606 = vmatmul.f32.vlgmr.msrb.gmra.mxu1 %v1811_v59 }
 0x2ee   :  { %626 = vmatmul.f32.vlgmr.msrb.gmra.mxu2 %v1811_v59  ;;  %840 = vmatpush.msrb.mxu0 %v1817_v51 }
 0x2ef   :  { %915 = vmatpush.msrb.mxu1 %v1173_v47  ;;  %935 = vmatpush.msrb.mxu2 %v1174_v48 }
 0x2f0   :  { %841 = vmatpush.msrb.mxu0 %v1820_v53 }
 0x2f1   :  { %916 = vmatpush.msrb.mxu1 %v1176_v42  ;;  %936 = vmatpush.msrb.mxu2 %v1177_v61 }
 0x2f2   :  { %842 = vmatpush.msrb.mxu0 %v1823_v57 }
 0x2f3   :  { %917 = vmatpush.msrb.mxu1 %v1179_v38  ;;  %937 = vmatpush.msrb.mxu2 %v1180_v60 }
 0x2f4   :  { %843 = vmatpush.msrb.mxu0 %v1826_v50 }
 0x2f5   :  { %918 = vmatpush.msrb.mxu1 %v1182_v39  ;;  %938 = vmatpush.msrb.mxu2 %v1183_v52 }
 0x2f6   :  { %844 = vmatpush.msrb.mxu0 %v1829_v56 }
 0x2f7   :  { %919 = vmatpush.msrb.mxu1 %v1185_v58  ;;  %939 = vmatpush.msrb.mxu2 %v1186_v0 }
 0x2f8   :  { %845 = vmatpush.msrb.mxu0 %v1832_v1 }
 0x2f9   :  { %920 = vmatpush.msrb.mxu1 %v1188_v2  ;;  %940 = vmatpush.msrb.mxu2 %v1189_v3 }
 0x2fa   :  { %846 = vmatpush.msrb.mxu0 %v1835_v4 }
 0x2fb   :  { %921 = vmatpush.msrb.mxu1 %v1191_v5  ;;  %941 = vmatpush.msrb.mxu2 %v1192_v6  ;;  %v569_v5 = vld [vmem:[#allocation3 + $0x70] sm:$0xff] }
 0x2fc   :  { %847 = vmatpush.msrb.mxu0 %v1838_v7 }
 0x2fd   :  { %922 = vmatpush.msrb.mxu1 %v1194_v8  ;;  %942 = vmatpush.msrb.mxu2 %v1195_v9 }
 0x2fe   :  { %848 = vmatpush.msrb.mxu0 %v1841_v10 }
 0x2ff   :  { %923 = vmatpush.msrb.mxu1 %v1197_v11  ;;  %943 = vmatpush.msrb.mxu2 %v1198_v12 }
 0x300   :  { %849 = vmatpush.msrb.mxu0 %v1844_v13 }
 0x301   :  { %924 = vmatpush.msrb.mxu1 %v1200_v14  ;;  %944 = vmatpush.msrb.mxu2 %v1201_v15 }
 0x302   :  { %850 = vmatpush.msrb.mxu0 %v1847_v16 }
 0x303   :  { %925 = vmatpush.msrb.mxu1 %v1203_v17  ;;  %945 = vmatpush.msrb.mxu2 %v1204_v18 }
 0x304   :  { %851 = vmatpush.msrb.mxu0 %v1850_v19 }
 0x305   :  { %926 = vmatpush.msrb.mxu1 %v1206_v20  ;;  %946 = vmatpush.msrb.mxu2 %v1207_v21 }
 0x306   :  { %852 = vmatpush.msrb.mxu0 %v1853_v22 }
 0x307   :  { %927 = vmatpush.msrb.mxu1 %v1209_v23  ;;  %947 = vmatpush.msrb.mxu2 %v1210_v24 }
 0x308   :  { %853 = vmatpush.msrb.mxu0 %v1856_v25 }
 0x309   :  { %928 = vmatpush.msrb.mxu1 %v1212_v26  ;;  %948 = vmatpush.msrb.mxu2 %v1213_v27 }
 0x30a   :  { %854 = vmatpush.msrb.mxu0 %v1859_v28 }
 0x30b   :  { %929 = vmatpush.msrb.mxu1 %v1215_v29  ;;  %949 = vmatpush.msrb.mxu2 %v1216_v30 }
 0x30c   :  { %855 = vmatpush.msrb.mxu0 %v1862_v31 }
 0x30d   :  { %930 = vmatpush.msrb.mxu1 %v1218_v32  ;;  %950 = vmatpush.msrb.mxu2 %v1219_v33 }
 0x36a   :  { %v587_v40 = vpop.f32.mrf.mxu0  ;;  %v607_v43 = vpop.f32.mrf.mxu1 }
 0x36b   :  { %v630_v45 = vadd.f32 %v587_v40, %v567_v34  ;;  %v650_v46 = vadd.f32 %v607_v43, %v568_v37 }
 0x36d   :  { %v1074_v55 = vmul.f32 -1.442695, %v630_v45  ;;  %v1075_v35 = vmul.f32 -1.442695, %v650_v46  ;;  %v684_v46 = vld [vmem:[#allocation3 + $0x88] sm:$0xff] }
 0x36f   :  { %1132 = vpow2.f32 %v1074_v55 }
 0x370   :  { %1134 = vpow2.f32 %v1075_v35 }
 0x371   :  { %v627_v39 = vpop.f32.mrf.mxu2 }
 0x372   :  { %v670_v3 = vadd.f32 %v1640_v44, %v627_v39 }
 0x375   :  { %v1133_v54 = vpop.eup %1132 }
 0x376   :  { %v1135_v36 = vpop.eup %1134  ;;  %v634_v41 = vadd.f32 1.0, %v1133_v54 }
 0x377   :  { %v654_v62 = vadd.f32 1.0, %v1135_v36 }
 0x378   :  { %1136 = vrcp.f32 %v634_v41  ;;  %v646_v61 = vand.u32 2147483648, %v634_v41  ;;  %v644_v60 = vand.u32 2147483647, %v634_v41  ;;  %vm640_vm1 = vweird.f32 %v634_v41 }
 0x379   :  { %1138 = vrcp.f32 %v654_v62  ;;  %v666_v14 = vand.u32 2147483648, %v654_v62  ;;  %vm660_vm5 = vweird.f32 %v654_v62  ;;  %v664_v15 = vand.u32 2147483647, %v654_v62 }
 0x37a   :  { %v647_v0 = vor.u32 1.1754944e-38, %v646_v61  ;;  %vm645_vm3 = vcmp.eq.f32.partialorder %v644_v60, 8.507059e+37  ;;  %v798_v60 = vld [vmem:[#allocation3 + $0x98] sm:$0xff] }
 0x37b   :  { %v667_v20 = vor.u32 1.1754944e-38, %v666_v14  ;;  %vm665_vm7 = vcmp.eq.f32.partialorder %v664_v15, 8.507059e+37 }
 0x37e   :  { %v1137_v63 = vpop.eup %1136 }
 0x37f   :  { %v1139_v49 = vpop.eup %1138  ;;  %v636_v47 = vmul.f32 %v1137_v63, %v634_v41  ;;  %vm641_vm0 = vweird.f32 %v1137_v63 }
 0x380   :  { %v656_v42 = vmul.f32 %v1139_v49, %v654_v62  ;;  %vm642_vm2 = vmor %vm640_vm1, %vm641_vm0  ;;  %vm661_vm4 = vweird.f32 %v1139_v49 }
 0x381   :  { %v637_v48 = vsub.f32 1.0, %v636_v47  ;;  %vm662_vm6 = vmor %vm660_vm5, %vm661_vm4 }
 0x382   :  { %v657_v58 = vsub.f32 1.0, %v656_v42 }
 0x383   :  { %v638_v38 = vmul.f32 %v1137_v63, %v637_v48 }
 0x384   :  { %v658_v9 = vmul.f32 %v1139_v49, %v657_v58 }
 0x385   :  { %v639_v52 = vadd.f32 %v1137_v63, %v638_v38  ;;  %v797_v38 = vld [vmem:[#allocation3 + $0x90] sm:$0xff] }
 0x386   :  { %v659_v12 = vadd.f32 %v1139_v49, %v658_v9 }
 0x387   :  { %v643_v2 = vsel %vm642_vm2, %v1137_v63, %v639_v52 }
 0x388   :  { %v648_v6 = vsel %vm645_vm3, %v647_v0, %v643_v2  ;;  %v663_v17 = vsel %vm662_vm6, %v1139_v49, %v659_v12 }
 0x389   :  { %v671_v8 = vmul.f32 %v670_v3, %v648_v6  ;;  %v668_v23 = vsel %vm665_vm7, %v667_v20, %v663_v17 }
 0x38b   :  { %v672_v11 = vadd.f32 %v671_v8, %v569_v5 }
 0x38d   :  { %1140 = vtanh.f32 %v672_v11 }
 0x393   :  { %v1141_v18 = vpop.eup %1140 }
 0x394   :  { %v674_v21 = vsub.f32 %v1811_v59, %v1141_v18  ;;  %v683_v59 = vld [vmem:[#allocation3 + $0x80] sm:$0xff] }
 0x396   :  { %v675_v24 = vmul.f32 %v674_v21, %v668_v23 }
 0x398   :  { %v1867_v26 = vadd.f32 %v1141_v18, %v675_v24 }
 0x39a   :  { %679 = vst [vmem:[#allocation8 + $0x20] sm:$0xff] %v1867_v26  ;;  %701 = vmatmul.f32.vlgmr.msrb.gmra.mxu3 %v1867_v26  ;;  %721 = vmatmul.f32.vlgmr.msra.gmra.mxu0 %v1867_v26 }
 0x39b   :  { %741 = vmatmul.f32.vlgmr.msra.gmra.mxu1 %v1867_v26  ;;  %955 = vmatpush.msrb.mxu3 %v1817_v51 }
 0x39d   :  { %956 = vmatpush.msrb.mxu3 %v1820_v53 }
 0x39f   :  { %957 = vmatpush.msrb.mxu3 %v1823_v57 }
 0x3a1   :  { %958 = vmatpush.msrb.mxu3 %v1826_v50  ;;  %v682_v50 = vld [vmem:[#allocation3 + $0x78] sm:$0xff] }
 0x3a3   :  { %959 = vmatpush.msrb.mxu3 %v1829_v56 }
 0x3a5   :  { %960 = vmatpush.msrb.mxu3 %v1832_v1 }
 0x3a7   :  { %961 = vmatpush.msrb.mxu3 %v1835_v4 }
 0x3a9   :  { %962 = vmatpush.msrb.mxu3 %v1838_v7 }
 0x3ab   :  { %963 = vmatpush.msrb.mxu3 %v1841_v10 }
 0x3ad   :  { %964 = vmatpush.msrb.mxu3 %v1844_v13 }
 0x3af   :  { %965 = vmatpush.msrb.mxu3 %v1847_v16 }
 0x3b1   :  { %966 = vmatpush.msrb.mxu3 %v1850_v19 }
 0x3b3   :  { %967 = vmatpush.msrb.mxu3 %v1853_v22 }
 0x3b5   :  { %968 = vmatpush.msrb.mxu3 %v1856_v25 }
 0x3b7   :  { %969 = vmatpush.msrb.mxu3 %v1859_v28 }
 0x3b9   :  { %970 = vmatpush.msrb.mxu3 %v1862_v31 }
 0x417   :  { %v722_v51 = vpop.f32.mrf.mxu0 }
 0x418   :  { %v765_v53 = vadd.f32 %v722_v51, %v683_v59  ;;  %v742_v32 = vpop.f32.mrf.mxu1  ;;  %v1220_v51 = vld [vmem:[%s1902_s2] ss:$0 sm:$0xff]  ;;  %s1330_s2 = smov [#allocation8]  }
 0x419   :  { %v785_v40 = vadd.f32 %v1640_v44, %v742_v32  ;;  %s1034_s29 = sshll.u32 %s1330_s2, 4  ;;  %s1035_s29 = int_to_ptr.vmem [resolvable:$true] %s1034_s29 }
 0x41a   :  { %v1077_v57 = vmul.f32 -1.442695, %v765_v53 }
 0x41c   :  { %1142 = vpow2.f32 %v1077_v57 }
 0x41d   :  { %v702_v56 = vpop.f32.mrf.mxu3 }
 0x41e   :  { %v745_v1 = vadd.f32 %v702_v56, %v682_v50  ;;  %v799_v56 = vld [vmem:[#allocation3 + $0xa0] sm:$0xff] }
 0x420   :  { %v1076_v4 = vmul.f32 -1.442695, %v745_v1 }
 0x422   :  { %1144 = vpow2.f32 %v1076_v4  ;;  %v1143_v7 = vpop.eup %1142 }
 0x423   :  { %v769_v13 = vadd.f32 1.0, %v1143_v7 }
 0x425   :  { %v781_v41 = vand.u32 2147483648, %v769_v13  ;;  %vm775_vm13 = vweird.f32 %v769_v13  ;;  %v779_v62 = vand.u32 2147483647, %v769_v13 }
 0x427   :  { %v782_v47 = vor.u32 1.1754944e-38, %v781_v41  ;;  %vm780_vm15 = vcmp.eq.f32.partialorder %v779_v62, 8.507059e+37 }
 0x428   :  { %v1145_v10 = vpop.eup %1144 }
 0x429   :  { %v749_v16 = vadd.f32 1.0, %v1145_v10 }
 0x42b   :  { %1146 = vrcp.f32 %v749_v16  ;;  %v761_v29 = vand.u32 2147483648, %v749_v16  ;;  %v759_v31 = vand.u32 2147483647, %v749_v16  ;;  %vm755_vm9 = vweird.f32 %v749_v16 }
 0x42c   :  { %1148 = vrcp.f32 %v769_v13 }
 0x42d   :  { %v762_v37 = vor.u32 1.1754944e-38, %v761_v29  ;;  %vm760_vm11 = vcmp.eq.f32.partialorder %v759_v31, 8.507059e+37  ;;  %v912_v31 = vld [vmem:[#allocation3 + $0xa8] sm:$0xff] }
 0x431   :  { %v1147_v19 = vpop.eup %1146 }
 0x432   :  { %v1149_v22 = vpop.eup %1148  ;;  %v751_v25 = vmul.f32 %v1147_v19, %v749_v16  ;;  %vm756_vm8 = vweird.f32 %v1147_v19 }
 0x433   :  { %v771_v28 = vmul.f32 %v1149_v22, %v769_v13  ;;  %vm757_vm10 = vmor %vm755_vm9, %vm756_vm8  ;;  %vm776_vm12 = vweird.f32 %v1149_v22 }
 0x434   :  { %v752_v27 = vsub.f32 1.0, %v751_v25  ;;  %vm777_vm14 = vmor %vm775_vm13, %vm776_vm12 }
 0x435   :  { %v772_v34 = vsub.f32 1.0, %v771_v28 }
 0x436   :  { %v753_v30 = vmul.f32 %v1147_v19, %v752_v27 }
 0x437   :  { %v773_v35 = vmul.f32 %v1149_v22, %v772_v34 }
 0x438   :  { %v754_v33 = vadd.f32 %v1147_v19, %v753_v30 }
 0x439   :  { %v774_v36 = vadd.f32 %v1149_v22, %v773_v35 }
 0x43a   :  { %v758_v43 = vsel %vm757_vm10, %v1147_v19, %v754_v33 }
 0x43b   :  { %v763_v45 = vsel %vm760_vm11, %v762_v37, %v758_v43  ;;  %v778_v63 = vsel %vm777_vm14, %v1149_v22, %v774_v36  ;;  %v913_v37 = vld [vmem:[#allocation3 + $0xb0] sm:$0xff] }
 0x43c   :  { %v786_v55 = vmul.f32 %v785_v40, %v763_v45  ;;  %v783_v48 = vsel %vm780_vm15, %v782_v47, %v778_v63 }
 0x43e   :  { %v787_v54 = vadd.f32 %v786_v55, %v684_v46 }
 0x440   :  { %1150 = vtanh.f32 %v787_v54 }
 0x446   :  { %v1151_v49 = vpop.eup %1150 }
 0x447   :  { %v789_v44 = vsub.f32 %v1867_v26, %v1151_v49 }
 0x449   :  { %v790_v42 = vmul.f32 %v789_v44, %v783_v48 }
 0x44b   :  { %v791_v61 = vadd.f32 %v1151_v49, %v790_v42 }
 0x44d   :  { %794 = vst [vmem:[#allocation8 + $0x28] sm:$0xff] %v791_v61  ;;  %816 = vmatmul.f32.vlgmr.msra.gmra.mxu2 %v791_v61  ;;  %836 = vmatmul.f32.vlgmr.msra.gmra.mxu3 %v791_v61 }
 0x44e   :  { %856 = vmatmul.f32.vlgmr.msrb.gmra.mxu0 %v791_v61 }
 0x4cb   :  { %v857_v23 = vpop.f32.mrf.mxu0 }
 0x4cc   :  { %v900_v53 = vadd.f32 %v1220_v51, %v857_v23 }
 0x4d0   :  { %v817_v39 = vpop.f32.mrf.mxu2  ;;  %v837_v52 = vpop.f32.mrf.mxu3 }
 0x4d1   :  { %v860_v58 = vadd.f32 %v817_v39, %v797_v38  ;;  %v880_v0 = vadd.f32 %v837_v52, %v798_v60 }
 0x4d3   :  { %v1078_v2 = vmul.f32 -1.442695, %v860_v58  ;;  %v1079_v3 = vmul.f32 -1.442695, %v880_v0  ;;  %v914_v58 = vld [vmem:[#allocation3 + $0xb8] sm:$0xff] }
 0x4d5   :  { %1152 = vpow2.f32 %v1078_v2 }
 0x4d6   :  { %1154 = vpow2.f32 %v1079_v3 }
 0x4db   :  { %v1153_v5 = vpop.eup %1152 }
 0x4dc   :  { %v1155_v6 = vpop.eup %1154  ;;  %v864_v8 = vadd.f32 1.0, %v1153_v5 }
 0x4dd   :  { %v884_v9 = vadd.f32 1.0, %v1155_v6 }
 0x4de   :  { %1156 = vrcp.f32 %v864_v8  ;;  %v876_v17 = vand.u32 2147483648, %v864_v8  ;;  %v874_v21 = vand.u32 2147483647, %v864_v8  ;;  %vm870_vm1 = vweird.f32 %v864_v8 }
 0x4df   :  { %1158 = vrcp.f32 %v884_v9  ;;  %v896_v13 = vand.u32 2147483648, %v884_v9  ;;  %vm890_vm5 = vweird.f32 %v884_v9  ;;  %v894_v16 = vand.u32 2147483647, %v884_v9 }
 0x4e0   :  { %v877_v26 = vor.u32 1.1754944e-38, %v876_v17  ;;  %vm875_vm3 = vcmp.eq.f32.partialorder %v874_v21, 8.507059e+37 }
 0x4e1   :  { %v897_v25 = vor.u32 1.1754944e-38, %v896_v13  ;;  %vm895_vm7 = vcmp.eq.f32.partialorder %v894_v16, 8.507059e+37 }
 0x4e4   :  { %v1157_v11 = vpop.eup %1156 }
 0x4e5   :  { %v1159_v12 = vpop.eup %1158  ;;  %v866_v14 = vmul.f32 %v1157_v11, %v864_v8  ;;  %vm871_vm0 = vweird.f32 %v1157_v11 }
 0x4e6   :  { %v886_v18 = vmul.f32 %v1159_v12, %v884_v9  ;;  %vm872_vm2 = vmor %vm870_vm1, %vm871_vm0  ;;  %vm891_vm4 = vweird.f32 %v1159_v12 }
 0x4e7   :  { %v867_v15 = vsub.f32 1.0, %v866_v14  ;;  %vm892_vm6 = vmor %vm890_vm5, %vm891_vm4 }
 0x4e8   :  { %v887_v59 = vsub.f32 1.0, %v886_v18 }
 0x4e9   :  { %v868_v20 = vmul.f32 %v1157_v11, %v867_v15 }
 0x4ea   :  { %v888_v4 = vmul.f32 %v1159_v12, %v887_v59 }
 0x4eb   :  { %v869_v24 = vadd.f32 %v1157_v11, %v868_v20 }
 0x4ec   :  { %v889_v10 = vadd.f32 %v1159_v12, %v888_v4 }
 0x4ed   :  { %v873_v57 = vsel %vm872_vm2, %v1157_v11, %v869_v24 }
 0x4ee   :  { %v878_v50 = vsel %vm875_vm3, %v877_v26, %v873_v57  ;;  %v893_v19 = vsel %vm892_vm6, %v1159_v12, %v889_v10 }
 0x4ef   :  { %v901_v1 = vmul.f32 %v900_v53, %v878_v50  ;;  %v898_v28 = vsel %vm895_vm7, %v897_v25, %v893_v19 }
 0x4f1   :  { %v902_v7 = vadd.f32 %v901_v1, %v799_v56 }
 0x4f3   :  { %1160 = vtanh.f32 %v902_v7 }
 0x4f9   :  { %v1161_v22 = vpop.eup %1160 }
 0x4fa   :  { %v904_v27 = vsub.f32 %v791_v61, %v1161_v22 }
 0x4fc   :  { %v905_v29 = vmul.f32 %v904_v27, %v898_v28 }
 0x4fe   :  { %v906_v30 = vadd.f32 %v1161_v22, %v905_v29 }
 0x500   :  { %909 = vst [vmem:[#allocation8 + $0x30] sm:$0xff] %v906_v30  ;;  %931 = vmatmul.f32.vlgmr.msrb.gmra.mxu1 %v906_v30  ;;  %951 = vmatmul.f32.vlgmr.msrb.gmra.mxu2 %v906_v30 }
 0x501   :  { %971 = vmatmul.f32.vlgmr.msrb.gmra.mxu3 %v906_v30 }
 0x57d   :  { %v932_v32 = vpop.f32.mrf.mxu1 }
 0x57e   :  { %v975_v33 = vadd.f32 %v932_v32, %v912_v31 }
 0x580   :  { %v1080_v34 = vmul.f32 -1.442695, %v975_v33 }
 0x582   :  { %1162 = vpow2.f32 %v1080_v34 }
 0x583   :  { %v952_v40 = vpop.f32.mrf.mxu2 }
 0x584   :  { %v995_v43 = vadd.f32 %v952_v40, %v913_v37  ;;  %v972_v48 = vpop.f32.mrf.mxu3 }
 0x585   :  { %v1015_v52 = vadd.f32 %v1220_v51, %v972_v48 }
 0x586   :  { %v1081_v45 = vmul.f32 -1.442695, %v995_v43 }
 0x588   :  { %v1163_v46 = vpop.eup %1162  ;;  %1164 = vpow2.f32 %v1081_v45 }
 0x589   :  { %v979_v55 = vadd.f32 1.0, %v1163_v46 }
 0x58b   :  { %1166 = vrcp.f32 %v979_v55  ;;  %v991_v63 = vand.u32 2147483648, %v979_v55  ;;  %v989_v47 = vand.u32 2147483647, %v979_v55  ;;  %vm985_vm9 = vweird.f32 %v979_v55 }
 0x58d   :  { %v992_v38 = vor.u32 1.1754944e-38, %v991_v63  ;;  %vm990_vm11 = vcmp.eq.f32.partialorder %v989_v47, 8.507059e+37 }
 0x58e   :  { %v1165_v35 = vpop.eup %1164 }
 0x58f   :  { %v999_v54 = vadd.f32 1.0, %v1165_v35 }
 0x591   :  { %v1167_v36 = vpop.eup %1166  ;;  %1168 = vrcp.f32 %v999_v54  ;;  %v1011_v8 = vand.u32 2147483648, %v999_v54  ;;  %vm1005_vm13 = vweird.f32 %v999_v54  ;;  %v1009_v9 = vand.u32 2147483647, %v999_v54 }
 0x592   :  { %v981_v41 = vmul.f32 %v1167_v36, %v979_v55  ;;  %vm986_vm8 = vweird.f32 %v1167_v36 }
 0x593   :  { %vm987_vm10 = vmor %vm985_vm9, %vm986_vm8  ;;  %v1012_v14 = vor.u32 1.1754944e-38, %v1011_v8  ;;  %vm1010_vm15 = vcmp.eq.f32.partialorder %v1009_v9, 8.507059e+37 }
 0x594   :  { %v982_v62 = vsub.f32 1.0, %v981_v41 }
 0x596   :  { %v983_v49 = vmul.f32 %v1167_v36, %v982_v62 }
 0x597   :  { %v1169_v44 = vpop.eup %1168 }
 0x598   :  { %v1001_v42 = vmul.f32 %v1169_v44, %v999_v54  ;;  %v984_v61 = vadd.f32 %v1167_v36, %v983_v49  ;;  %vm1006_vm12 = vweird.f32 %v1169_v44 }
 0x599   :  { %vm1007_vm14 = vmor %vm1005_vm13, %vm1006_vm12 }
 0x59a   :  { %v1002_v60 = vsub.f32 1.0, %v1001_v42  ;;  %v988_v39 = vsel %vm987_vm10, %v1167_v36, %v984_v61 }
 0x59b   :  { %v993_v0 = vsel %vm990_vm11, %v992_v38, %v988_v39 }
 0x59c   :  { %v1016_v2 = vmul.f32 %v1015_v52, %v993_v0  ;;  %v1003_v3 = vmul.f32 %v1169_v44, %v1002_v60 }
 0x59e   :  { %v1017_v5 = vadd.f32 %v1016_v2, %v914_v58  ;;  %v1004_v6 = vadd.f32 %v1169_v44, %v1003_v3 }
 0x5a0   :  { %1170 = vtanh.f32 %v1017_v5  ;;  %v1008_v11 = vsel %vm1007_vm14, %v1169_v44, %v1004_v6 }
 0x5a1   :  { %v1013_v17 = vsel %vm1010_vm15, %v1012_v14, %v1008_v11 }
 0x5a6   :  { %v1171_v12 = vpop.eup %1170 }
 0x5a7   :  { %v1019_v15 = vsub.f32 %v906_v30, %v1171_v12 }
 0x5a9   :  { %v1020_v18 = vmul.f32 %v1019_v15, %v1013_v17 }
 0x5ab   :  { %v1021_v20 = vadd.f32 %v1171_v12, %v1020_v18 }
 0x5ad   :  { %1024 = vst [vmem:[#allocation8 + $0x38] sm:$0xff] %v1021_v20 }
 0x5ae   :  { %1029 = vst [vmem:[#allocation9] sm:$0xff] %v1021_v20  ;;  %1042 = dma.vmem_to_hbm [thread:$0]  %s1035_s29, 1024, %s1037_s6, [#allocation5], %s1332_s12, %s1332_s12, %s1333_s13  }
 0x5af   :  { %1053 = dma.vmem_to_hbm [thread:$0]  %s1049_s8, 128, %s1051_s11, [#allocation10]  }
 0x5b0   :  { %1321 = dma.done.wait [#allocation5], 1024  }
 0x5b1   :  { %1322 = vsyncadd [#allocation5], 4294966272 }
 0x5b2   :  { %1323 = dma.done.wait [#allocation10], 128  }
 0x5b3   :  { %1324 = vsyncadd [#allocation10], 4294967168 }
 0x5b4   :  { %1062 = vsyncpa [#allocation4], 1 }
 0x5b5   :  { %1063 = vsyncpa [#allocation7], 1 }
 0x5b6   :  { %1064 = vsyncpa [#allocation5], 1 }
 0x5b7   :  { %1065 = vsyncpa [#allocation10], 1 }

</bundles_post_ra>
